<compile_context>
chip_gen: v5e
topology: v5e:2x2
jax: 0.10.0
libtpu: 0.0.40
codegen_flags: <defaults>
</compile_context>

<pallas_src>
import math

import jax
import jax.numpy as jnp
from jax.experimental import pallas as pl
from jax.experimental.pallas import tpu as pltpu

# ----------------------------- model config ---------------------------------
B = 2            # batch
S = 8            # source seq len
T = 8            # target seq len
INPUT_DIM = 4    # continuous input/output feature dim
EMB_DIM = 32     # embedding dim
HID_DIM = 32     # conv hidden dim
KERNEL = 3       # conv kernel size (odd)
N_LAYERS = 2     # conv layers in encoder and decoder
MAX_LEN = 16     # positional table length
OUT_PAD = 128    # lane-dense padded output feature dim (>= INPUT_DIM)
SCALE = math.sqrt(0.5)


# ----------------------------- fused Pallas kernel ---------------------------
def _seq2seq_fused_kernel(*refs):
    (src_ref, dec_ref, e_sm_ref, d_sm_ref,
     e_emb_w, e_emb_b, e_pos, e_e2h_w, e_e2h_b,
     e_cwa, e_cba, e_cwb, e_cbb, e_h2e_w, e_h2e_b,
     d_emb_w, d_emb_b, d_pos, d_e2h_w, d_e2h_b,
     d_cwa, d_cba, d_cwb, d_cbb,
     a_h2e_w, a_h2e_b, a_e2h_w, a_e2h_b,
     d_h2e_w, d_h2e_b, o_w, o_b,
     out_ref) = refs

    def mm(x, w):
        return jnp.dot(x, w, preferred_element_type=jnp.float32)

    def conv_glu(x, sm_ref, wa_ref, ba_ref, wb_ref, bb_ref, layer):
        # Zero-padded 1-D conv as tiny shift-matrix matmuls (all on the MXU).
        # Shifted rows are shared between the GLU value/gate branches and the
        # K taps are folded into one [L, K*H] @ [K*H, H] matmul per branch.
        x_cat = jnp.concatenate(
            [mm(sm_ref[k, :, :], x) for k in range(KERNEL)], axis=-1)   # [L, K*H]
        a = mm(x_cat, wa_ref[layer, :, :]) + ba_ref[layer, :, :]        # [L, H]
        g = mm(x_cat, wb_ref[layer, :, :]) + bb_ref[layer, :, :]        # [L, H]
        return a * jax.nn.sigmoid(g)

    # ---------------- encoder (per batch element) ----------------
    src = src_ref[0]                                            # [S, INPUT_DIM]
    emb_e = mm(src, e_emb_w[...]) + e_emb_b[...] + e_pos[...]   # [S, E]
    x = mm(emb_e, e_e2h_w[...]) + e_e2h_b[...]                  # [S, H]
    for layer in range(N_LAYERS):
        conved = conv_glu(x, e_sm_ref, e_cwa, e_cba, e_cwb, e_cbb, layer)
        x = (conved + x) * SCALE                                # fused residual
    enc_conved = mm(x, e_h2e_w[...]) + e_h2e_b[...]             # [S, E]
    enc_combined = (enc_conved + emb_e) * SCALE                 # [S, E]

    # ---------------- decoder (per batch element) ----------------
    dec = dec_ref[0]                                            # [T, INPUT_DIM]
    emb_d = mm(dec, d_emb_w[...]) + d_emb_b[...] + d_pos[...]   # [T, E]
    x = mm(emb_d, d_e2h_w[...]) + d_e2h_b[...]                  # [T, H]
    for layer in range(N_LAYERS):
        conved = conv_glu(x, d_sm_ref, d_cwa, d_cba, d_cwb, d_cbb, layer)
        # attention: q from conved, keys = enc_conved, values = enc_combined
        q = (mm(conved, a_h2e_w[...]) + a_h2e_b[...] + emb_d) * SCALE   # [T, E]
        energy = jax.lax.dot_general(
            q, enc_conved, (((1,), (1,)), ((), ())),
            preferred_element_type=jnp.float32)                          # [T, S]
        m = jnp.max(energy, axis=-1, keepdims=True)
        p = jnp.exp(energy - m)
        attn = p * pl.reciprocal(jnp.sum(p, axis=-1, keepdims=True), approx=True)
        attended = mm(attn, enc_combined)                                # [T, E]
        attended_h = mm(attended, a_e2h_w[...]) + a_e2h_b[...]           # [T, H]
        conved = (conved + attended_h) * SCALE
        x = (conved + x) * SCALE

    dec_emb_out = mm(x, d_h2e_w[...]) + d_h2e_b[...]            # [T, E]
    out_ref[0] = mm(dec_emb_out, o_w[...]) + o_b[...]           # [T, OUT_PAD] lane-dense


# ----------------------------- wrapper ---------------------------------------
def _shift_mats(length, offsets):
    # Shift_d[t, j] = 1 iff j == t + d (zero-padded sequence shift as a matmul).
    rows = jnp.arange(length, dtype=jnp.int32)[:, None]
    cols = jnp.arange(length, dtype=jnp.int32)[None, :]
    return jnp.stack([(cols == rows + d).astype(jnp.float32) for d in offsets])


def seq2seq_forward(params, source, target):
    bsz, s_len, _ = source.shape
    t_len = target.shape[1]
    # training-mode decoder input: cat(source, target[:, :-1])[:, -trg_len:]
    dec_in = jnp.concatenate([source, target[:, :-1]], axis=1)[:, -t_len:]

    # Host-side constants: conv shift matrices (centered for enc, causal for dec)
    enc_sm = _shift_mats(s_len, [k - (KERNEL - 1) // 2 for k in range(KERNEL)])
    dec_sm = _shift_mats(t_len, [k - (KERNEL - 1) for k in range(KERNEL)])

    kh = KERNEL * HID_DIM
    weights = (
        params["enc_emb_w"], params["enc_emb_b"], params["enc_pos"][:s_len],
        params["enc_e2h_w"], params["enc_e2h_b"],
        params["enc_conv_wa"].reshape(N_LAYERS, kh, HID_DIM), params["enc_conv_ba"],
        params["enc_conv_wb"].reshape(N_LAYERS, kh, HID_DIM), params["enc_conv_bb"],
        params["enc_h2e_w"], params["enc_h2e_b"],
        params["dec_emb_w"], params["dec_emb_b"], params["dec_pos"][:t_len],
        params["dec_e2h_w"], params["dec_e2h_b"],
        params["dec_conv_wa"].reshape(N_LAYERS, kh, HID_DIM), params["dec_conv_ba"],
        params["dec_conv_wb"].reshape(N_LAYERS, kh, HID_DIM), params["dec_conv_bb"],
        params["attn_h2e_w"], params["attn_h2e_b"],
        params["attn_e2h_w"], params["attn_e2h_b"],
        params["dec_h2e_w"], params["dec_h2e_b"],
        params["out_w"], params["out_b"],
    )
    consts = (enc_sm, dec_sm) + weights

    def _full_spec(arr):
        nd = arr.ndim
        return pl.BlockSpec(arr.shape, lambda b, _nd=nd: (0,) * _nd)

    in_specs = [pl.BlockSpec((1, s_len, INPUT_DIM), lambda b: (b, 0, 0)),
                pl.BlockSpec((1, t_len, INPUT_DIM), lambda b: (b, 0, 0))]
    in_specs += [_full_spec(c) for c in consts]

    out_pad = pl.pallas_call(
        _seq2seq_fused_kernel,
        out_shape=jax.ShapeDtypeStruct((bsz, t_len, OUT_PAD), jnp.float32),
        grid=(bsz,),
        in_specs=in_specs,
        out_specs=pl.BlockSpec((1, t_len, OUT_PAD), lambda b: (b, 0, 0)),
        compiler_params=pltpu.CompilerParams(
            dimension_semantics=("parallel",)),
    )(source, dec_in, *consts)
    return out_pad[:, :, :INPUT_DIM]


# ----------------------------- pure-JAX reference ----------------------------
def ref_forward(params, source, target):
    s_len = source.shape[1]
    t_len = target.shape[1]

    def shift_seq(x, d):
        length = x.shape[1]
        if d == 0:
            return x
        if d > 0:
            return jnp.pad(x[:, d:, :], ((0, 0), (0, d), (0, 0)))
        dd = -d
        return jnp.pad(x[:, :length - dd, :], ((0, 0), (dd, 0), (0, 0)))

    def conv_glu(x, wa, ba, wb, bb, offsets):
        a, g = ba, bb
        for k, d in enumerate(offsets):
            xs = shift_seq(x, d)
            a = a + jnp.einsum('blh,hm->blm', xs, wa[k])
            g = g + jnp.einsum('blh,hm->blm', xs, wb[k])
        return a * jax.nn.sigmoid(g)

    enc_off = [k - (KERNEL - 1) // 2 for k in range(KERNEL)]
    dec_off = [k - (KERNEL - 1) for k in range(KERNEL)]

    emb_e = source @ params["enc_emb_w"] + params["enc_emb_b"] + params["enc_pos"][:s_len][None]
    x = emb_e @ params["enc_e2h_w"] + params["enc_e2h_b"]
    for layer in range(N_LAYERS):
        conved = conv_glu(x, params["enc_conv_wa"][layer], params["enc_conv_ba"][layer],
                          params["enc_conv_wb"][layer], params["enc_conv_bb"][layer], enc_off)
        x = (conved + x) * SCALE
    enc_conved = x @ params["enc_h2e_w"] + params["enc_h2e_b"]
    enc_combined = (enc_conved + emb_e) * SCALE

    dec_in = jnp.concatenate([source, target[:, :-1]], axis=1)[:, -t_len:]
    emb_d = dec_in @ params["dec_emb_w"] + params["dec_emb_b"] + params["dec_pos"][:t_len][None]
    x = emb_d @ params["dec_e2h_w"] + params["dec_e2h_b"]
    for layer in range(N_LAYERS):
        conved = conv_glu(x, params["dec_conv_wa"][layer], params["dec_conv_ba"][layer],
                          params["dec_conv_wb"][layer], params["dec_conv_bb"][layer], dec_off)
        q = (conved @ params["attn_h2e_w"] + params["attn_h2e_b"] + emb_d) * SCALE
        energy = jnp.einsum('bte,bse->bts', q, enc_conved)
        attn = jax.nn.softmax(energy, axis=-1)
        attended = jnp.einsum('bts,bse->bte', attn, enc_combined)
        attended_h = attended @ params["attn_e2h_w"] + params["attn_e2h_b"]
        conved = (conved + attended_h) * SCALE
        x = (conved + x) * SCALE
    out = (x @ params["dec_h2e_w"] + params["dec_h2e_b"]) @ params["out_w"] + params["out_b"]
    return out[:, :, :INPUT_DIM]


# ----------------------------- parameter init --------------------------------
def _uniform(key, shape, bound):
    return jax.random.uniform(key, shape, jnp.float32, -bound, bound)


def init_params(key):
    keys = iter(jax.random.split(key, 64))
    b_in = 1.0 / math.sqrt(INPUT_DIM)
    b_emb = 1.0 / math.sqrt(EMB_DIM)
    b_hid = 1.0 / math.sqrt(HID_DIM)
    b_cv = 1.0 / math.sqrt(KERNEL * HID_DIM)
    p = {}
    # encoder
    p["enc_emb_w"] = _uniform(next(keys), (INPUT_DIM, EMB_DIM), b_in)
    p["enc_emb_b"] = _uniform(next(keys), (1, EMB_DIM), b_in)
    p["enc_pos"] = jax.random.normal(next(keys), (MAX_LEN, EMB_DIM), jnp.float32)
    p["enc_e2h_w"] = _uniform(next(keys), (EMB_DIM, HID_DIM), b_emb)
    p["enc_e2h_b"] = _uniform(next(keys), (1, HID_DIM), b_emb)
    p["enc_conv_wa"] = _uniform(next(keys), (N_LAYERS, KERNEL, HID_DIM, HID_DIM), b_cv)
    p["enc_conv_ba"] = _uniform(next(keys), (N_LAYERS, 1, HID_DIM), b_cv)
    p["enc_conv_wb"] = _uniform(next(keys), (N_LAYERS, KERNEL, HID_DIM, HID_DIM), b_cv)
    p["enc_conv_bb"] = _uniform(next(keys), (N_LAYERS, 1, HID_DIM), b_cv)
    p["enc_h2e_w"] = _uniform(next(keys), (HID_DIM, EMB_DIM), b_hid)
    p["enc_h2e_b"] = _uniform(next(keys), (1, EMB_DIM), b_hid)
    # decoder
    p["dec_emb_w"] = _uniform(next(keys), (INPUT_DIM, EMB_DIM), b_in)
    p["dec_emb_b"] = _uniform(next(keys), (1, EMB_DIM), b_in)
    p["dec_pos"] = jax.random.normal(next(keys), (MAX_LEN, EMB_DIM), jnp.float32)
    p["dec_e2h_w"] = _uniform(next(keys), (EMB_DIM, HID_DIM), b_emb)
    p["dec_e2h_b"] = _uniform(next(keys), (1, HID_DIM), b_emb)
    p["dec_conv_wa"] = _uniform(next(keys), (N_LAYERS, KERNEL, HID_DIM, HID_DIM), b_cv)
    p["dec_conv_ba"] = _uniform(next(keys), (N_LAYERS, 1, HID_DIM), b_cv)
    p["dec_conv_wb"] = _uniform(next(keys), (N_LAYERS, KERNEL, HID_DIM, HID_DIM), b_cv)
    p["dec_conv_bb"] = _uniform(next(keys), (N_LAYERS, 1, HID_DIM), b_cv)
    p["attn_h2e_w"] = _uniform(next(keys), (HID_DIM, EMB_DIM), b_hid)
    p["attn_h2e_b"] = _uniform(next(keys), (1, EMB_DIM), b_hid)
    p["attn_e2h_w"] = _uniform(next(keys), (EMB_DIM, HID_DIM), b_emb)
    p["attn_e2h_b"] = _uniform(next(keys), (1, HID_DIM), b_emb)
    p["dec_h2e_w"] = _uniform(next(keys), (HID_DIM, EMB_DIM), b_hid)
    p["dec_h2e_b"] = _uniform(next(keys), (1, EMB_DIM), b_hid)
    # output projection, zero-padded to OUT_PAD lanes for a lane-dense store
    ow = _uniform(next(keys), (EMB_DIM, INPUT_DIM), b_emb)
    ob = _uniform(next(keys), (1, INPUT_DIM), b_emb)
    p["out_w"] = jnp.zeros((EMB_DIM, OUT_PAD), jnp.float32).at[:, :INPUT_DIM].set(ow)
    p["out_b"] = jnp.zeros((1, OUT_PAD), jnp.float32).at[:, :INPUT_DIM].set(ob)
    return p


# ----------------------------- main ------------------------------------------
if __name__ == "__main__":
    key = jax.random.PRNGKey(0)
    k_src, k_trg, k_par = jax.random.split(key, 3)
    source = jax.random.normal(k_src, (B, S, INPUT_DIM), jnp.float32)
    target = jax.random.normal(k_trg, (B, T, INPUT_DIM), jnp.float32)
    params = init_params(k_par)

    fwd = jax.jit(seq2seq_forward)
    out = jax.block_until_ready(fwd(params, source, target))

    assert out.shape == (B, T, INPUT_DIM), out.shape
    assert out.dtype == jnp.float32
    assert bool(jnp.all(jnp.isfinite(out)))

    ref = jax.jit(ref_forward)(params, source, target)
    max_err = float(jnp.max(jnp.abs(out - ref)))
    assert bool(jnp.allclose(out, ref, rtol=2e-2, atol=2e-2)), max_err

    print("KERNEL_OK")
</pallas_src>

<mosaic_0001>
module attributes {stable_mosaic.version = 11 : i64} {
  func.func @_seq2seq_fused_kernel(%arg0: i32, %arg1: memref<1x8x4xf32, #tpu.memory_space<vmem>>, %arg2: memref<1x8x4xf32, #tpu.memory_space<vmem>>, %arg3: memref<3x8x8xf32, #tpu.memory_space<vmem>>, %arg4: memref<3x8x8xf32, #tpu.memory_space<vmem>>, %arg5: memref<4x32xf32, #tpu.memory_space<vmem>>, %arg6: memref<1x32xf32, #tpu.memory_space<vmem>>, %arg7: memref<8x32xf32, #tpu.memory_space<vmem>>, %arg8: memref<32x32xf32, #tpu.memory_space<vmem>>, %arg9: memref<1x32xf32, #tpu.memory_space<vmem>>, %arg10: memref<2x96x32xf32, #tpu.memory_space<vmem>>, %arg11: memref<2x1x32xf32, #tpu.memory_space<vmem>>, %arg12: memref<2x96x32xf32, #tpu.memory_space<vmem>>, %arg13: memref<2x1x32xf32, #tpu.memory_space<vmem>>, %arg14: memref<32x32xf32, #tpu.memory_space<vmem>>, %arg15: memref<1x32xf32, #tpu.memory_space<vmem>>, %arg16: memref<4x32xf32, #tpu.memory_space<vmem>>, %arg17: memref<1x32xf32, #tpu.memory_space<vmem>>, %arg18: memref<8x32xf32, #tpu.memory_space<vmem>>, %arg19: memref<32x32xf32, #tpu.memory_space<vmem>>, %arg20: memref<1x32xf32, #tpu.memory_space<vmem>>, %arg21: memref<2x96x32xf32, #tpu.memory_space<vmem>>, %arg22: memref<2x1x32xf32, #tpu.memory_space<vmem>>, %arg23: memref<2x96x32xf32, #tpu.memory_space<vmem>>, %arg24: memref<2x1x32xf32, #tpu.memory_space<vmem>>, %arg25: memref<32x32xf32, #tpu.memory_space<vmem>>, %arg26: memref<1x32xf32, #tpu.memory_space<vmem>>, %arg27: memref<32x32xf32, #tpu.memory_space<vmem>>, %arg28: memref<1x32xf32, #tpu.memory_space<vmem>>, %arg29: memref<32x32xf32, #tpu.memory_space<vmem>>, %arg30: memref<1x32xf32, #tpu.memory_space<vmem>>, %arg31: memref<32x128xf32, #tpu.memory_space<vmem>>, %arg32: memref<1x128xf32, #tpu.memory_space<vmem>>, %arg33: memref<1x8x128xf32, #tpu.memory_space<vmem>>) attributes {dimension_semantics = [#tpu.dimension_semantics<parallel>], iteration_bounds = array<i64: 2>, scalar_prefetch = 0 : i64, scratch_operands = 0 : i64, tpu.core_type = #tpu.core_type<tc>, window_params = [{transform_indices = @transform_0, window_bounds = array<i64: 1, 8, 4>}, {transform_indices = @transform_1, window_bounds = array<i64: 1, 8, 4>}, {pipeline_mode = #tpu.pipeline_mode<synchronous>, transform_indices = @transform_2, window_bounds = array<i64: 3, 8, 8>}, {pipeline_mode = #tpu.pipeline_mode<synchronous>, transform_indices = @transform_3, window_bounds = array<i64: 3, 8, 8>}, {pipeline_mode = #tpu.pipeline_mode<synchronous>, transform_indices = @transform_4, window_bounds = array<i64: 4, 32>}, {pipeline_mode = #tpu.pipeline_mode<synchronous>, transform_indices = @transform_5, window_bounds = array<i64: 1, 32>}, {pipeline_mode = #tpu.pipeline_mode<synchronous>, transform_indices = @transform_6, window_bounds = array<i64: 8, 32>}, {pipeline_mode = #tpu.pipeline_mode<synchronous>, transform_indices = @transform_7, window_bounds = array<i64: 32, 32>}, {pipeline_mode = #tpu.pipeline_mode<synchronous>, transform_indices = @transform_8, window_bounds = array<i64: 1, 32>}, {pipeline_mode = #tpu.pipeline_mode<synchronous>, transform_indices = @transform_9, window_bounds = array<i64: 2, 96, 32>}, {pipeline_mode = #tpu.pipeline_mode<synchronous>, transform_indices = @transform_10, window_bounds = array<i64: 2, 1, 32>}, {pipeline_mode = #tpu.pipeline_mode<synchronous>, transform_indices = @transform_11, window_bounds = array<i64: 2, 96, 32>}, {pipeline_mode = #tpu.pipeline_mode<synchronous>, transform_indices = @transform_12, window_bounds = array<i64: 2, 1, 32>}, {pipeline_mode = #tpu.pipeline_mode<synchronous>, transform_indices = @transform_13, window_bounds = array<i64: 32, 32>}, {pipeline_mode = #tpu.pipeline_mode<synchronous>, transform_indices = @transform_14, window_bounds = array<i64: 1, 32>}, {pipeline_mode = #tpu.pipeline_mode<synchronous>, transform_indices = @transform_15, window_bounds = array<i64: 4, 32>}, {pipeline_mode = #tpu.pipeline_mode<synchronous>, transform_indices = @transform_16, window_bounds = array<i64: 1, 32>}, {pipeline_mode = #tpu.pipeline_mode<synchronous>, transform_indices = @transform_17, window_bounds = array<i64: 8, 32>}, {pipeline_mode = #tpu.pipeline_mode<synchronous>, transform_indices = @transform_18, window_bounds = array<i64: 32, 32>}, {pipeline_mode = #tpu.pipeline_mode<synchronous>, transform_indices = @transform_19, window_bounds = array<i64: 1, 32>}, {pipeline_mode = #tpu.pipeline_mode<synchronous>, transform_indices = @transform_20, window_bounds = array<i64: 2, 96, 32>}, {pipeline_mode = #tpu.pipeline_mode<synchronous>, transform_indices = @transform_21, window_bounds = array<i64: 2, 1, 32>}, {pipeline_mode = #tpu.pipeline_mode<synchronous>, transform_indices = @transform_22, window_bounds = array<i64: 2, 96, 32>}, {pipeline_mode = #tpu.pipeline_mode<synchronous>, transform_indices = @transform_23, window_bounds = array<i64: 2, 1, 32>}, {pipeline_mode = #tpu.pipeline_mode<synchronous>, transform_indices = @transform_24, window_bounds = array<i64: 32, 32>}, {pipeline_mode = #tpu.pipeline_mode<synchronous>, transform_indices = @transform_25, window_bounds = array<i64: 1, 32>}, {pipeline_mode = #tpu.pipeline_mode<synchronous>, transform_indices = @transform_26, window_bounds = array<i64: 32, 32>}, {pipeline_mode = #tpu.pipeline_mode<synchronous>, transform_indices = @transform_27, window_bounds = array<i64: 1, 32>}, {pipeline_mode = #tpu.pipeline_mode<synchronous>, transform_indices = @transform_28, window_bounds = array<i64: 32, 32>}, {pipeline_mode = #tpu.pipeline_mode<synchronous>, transform_indices = @transform_29, window_bounds = array<i64: 1, 32>}, {pipeline_mode = #tpu.pipeline_mode<synchronous>, transform_indices = @transform_30, window_bounds = array<i64: 32, 128>}, {pipeline_mode = #tpu.pipeline_mode<synchronous>, transform_indices = @transform_31, window_bounds = array<i64: 1, 128>}, {transform_indices = @transform_32, window_bounds = array<i64: 1, 8, 128>}]} {
    %c0 = arith.constant 0 : index
    %c0_0 = arith.constant 0 : index
    %c0_1 = arith.constant 0 : index
    %0 = vector.load %arg1[%c0, %c0_0, %c0_1] : memref<1x8x4xf32, #tpu.memory_space<vmem>>, vector<1x8x4xf32>
    %1 = vector.shape_cast %0 : vector<1x8x4xf32> to vector<8x4xf32>
    %c0_2 = arith.constant 0 : index
    %c0_3 = arith.constant 0 : index
    %2 = vector.load %arg5[%c0_2, %c0_3] : memref<4x32xf32, #tpu.memory_space<vmem>>, vector<4x32xf32>
    %cst = arith.constant dense<0.000000e+00> : vector<8x32xf32>
    %3 = tpu.matmul %1, %2, %cst {dimension_numbers = #tpu.dot_dimension_numbers<[1], [0], [0], [1], [0, 0, 1, 1], [], []>} : vector<8x4xf32>, vector<4x32xf32>, vector<8x32xf32> -> vector<8x32xf32>
    %c0_4 = arith.constant 0 : index
    %c0_5 = arith.constant 0 : index
    %4 = vector.load %arg6[%c0_4, %c0_5] : memref<1x32xf32, #tpu.memory_space<vmem>>, vector<1x32xf32>
    %5 = vector.broadcast %4 : vector<1x32xf32> to vector<8x32xf32>
    %6 = arith.addf %3, %5 : vector<8x32xf32>
    %c0_6 = arith.constant 0 : index
    %c0_7 = arith.constant 0 : index
    %7 = vector.load %arg7[%c0_6, %c0_7] : memref<8x32xf32, #tpu.memory_space<vmem>>, vector<8x32xf32>
    %8 = arith.addf %6, %7 : vector<8x32xf32>
    %c0_8 = arith.constant 0 : index
    %c0_9 = arith.constant 0 : index
    %9 = vector.load %arg8[%c0_8, %c0_9] : memref<32x32xf32, #tpu.memory_space<vmem>>, vector<32x32xf32>
    %cst_10 = arith.constant dense<0.000000e+00> : vector<8x32xf32>
    %10 = tpu.matmul %8, %9, %cst_10 {dimension_numbers = #tpu.dot_dimension_numbers<[1], [0], [0], [1], [0, 0, 1, 1], [], []>} : vector<8x32xf32>, vector<32x32xf32>, vector<8x32xf32> -> vector<8x32xf32>
    %c0_11 = arith.constant 0 : index
    %c0_12 = arith.constant 0 : index
    %11 = vector.load %arg9[%c0_11, %c0_12] : memref<1x32xf32, #tpu.memory_space<vmem>>, vector<1x32xf32>
    %12 = vector.broadcast %11 : vector<1x32xf32> to vector<8x32xf32>
    %13 = arith.addf %10, %12 : vector<8x32xf32>
    %c0_13 = arith.constant 0 : index
    %c0_14 = arith.constant 0 : index
    %c0_15 = arith.constant 0 : index
    %14 = vector.load %arg3[%c0_13, %c0_14, %c0_15] : memref<3x8x8xf32, #tpu.memory_space<vmem>>, vector<1x8x8xf32>
    %15 = vector.shape_cast %14 : vector<1x8x8xf32> to vector<8x8xf32>
    %cst_16 = arith.constant dense<0.000000e+00> : vector<8x32xf32>
    %16 = tpu.matmul %15, %13, %cst_16 {dimension_numbers = #tpu.dot_dimension_numbers<[1], [0], [0], [1], [0, 0, 1, 1], [], []>} : vector<8x8xf32>, vector<8x32xf32>, vector<8x32xf32> -> vector<8x32xf32>
    %c1 = arith.constant 1 : index
    %c0_17 = arith.constant 0 : index
    %c0_18 = arith.constant 0 : index
    %17 = vector.load %arg3[%c1, %c0_17, %c0_18] : memref<3x8x8xf32, #tpu.memory_space<vmem>>, vector<1x8x8xf32>
    %18 = vector.shape_cast %17 : vector<1x8x8xf32> to vector<8x8xf32>
    %cst_19 = arith.constant dense<0.000000e+00> : vector<8x32xf32>
    %19 = tpu.matmul %18, %13, %cst_19 {dimension_numbers = #tpu.dot_dimension_numbers<[1], [0], [0], [1], [0, 0, 1, 1], [], []>} : vector<8x8xf32>, vector<8x32xf32>, vector<8x32xf32> -> vector<8x32xf32>
    %c2 = arith.constant 2 : index
    %c0_20 = arith.constant 0 : index
    %c0_21 = arith.constant 0 : index
    %20 = vector.load %arg3[%c2, %c0_20, %c0_21] : memref<3x8x8xf32, #tpu.memory_space<vmem>>, vector<1x8x8xf32>
    %21 = vector.shape_cast %20 : vector<1x8x8xf32> to vector<8x8xf32>
    %cst_22 = arith.constant dense<0.000000e+00> : vector<8x32xf32>
    %22 = tpu.matmul %21, %13, %cst_22 {dimension_numbers = #tpu.dot_dimension_numbers<[1], [0], [0], [1], [0, 0, 1, 1], [], []>} : vector<8x8xf32>, vector<8x32xf32>, vector<8x32xf32> -> vector<8x32xf32>
    %23 = tpu.concatenate %16, %19, %22 in 1 : vector<8x32xf32>, vector<8x32xf32>, vector<8x32xf32> -> vector<8x96xf32>
    %c0_23 = arith.constant 0 : index
    %c0_24 = arith.constant 0 : index
    %c0_25 = arith.constant 0 : index
    %24 = vector.load %arg10[%c0_23, %c0_24, %c0_25] : memref<2x96x32xf32, #tpu.memory_space<vmem>>, vector<1x96x32xf32>
    %25 = vector.shape_cast %24 : vector<1x96x32xf32> to vector<96x32xf32>
    %cst_26 = arith.constant dense<0.000000e+00> : vector<8x32xf32>
    %26 = tpu.matmul %23, %25, %cst_26 {dimension_numbers = #tpu.dot_dimension_numbers<[1], [0], [0], [1], [0, 0, 1, 1], [], []>} : vector<8x96xf32>, vector<96x32xf32>, vector<8x32xf32> -> vector<8x32xf32>
    %c0_27 = arith.constant 0 : index
    %c0_28 = arith.constant 0 : index
    %c0_29 = arith.constant 0 : index
    %27 = vector.load %arg11[%c0_27, %c0_28, %c0_29] : memref<2x1x32xf32, #tpu.memory_space<vmem>>, vector<1x1x32xf32>
    %28 = vector.shape_cast %27 : vector<1x1x32xf32> to vector<1x32xf32>
    %29 = vector.broadcast %28 : vector<1x32xf32> to vector<8x32xf32>
    %30 = arith.addf %26, %29 : vector<8x32xf32>
    %c0_30 = arith.constant 0 : index
    %c0_31 = arith.constant 0 : index
    %c0_32 = arith.constant 0 : index
    %31 = vector.load %arg12[%c0_30, %c0_31, %c0_32] : memref<2x96x32xf32, #tpu.memory_space<vmem>>, vector<1x96x32xf32>
    %32 = vector.shape_cast %31 : vector<1x96x32xf32> to vector<96x32xf32>
    %cst_33 = arith.constant dense<0.000000e+00> : vector<8x32xf32>
    %33 = tpu.matmul %23, %32, %cst_33 {dimension_numbers = #tpu.dot_dimension_numbers<[1], [0], [0], [1], [0, 0, 1, 1], [], []>} : vector<8x96xf32>, vector<96x32xf32>, vector<8x32xf32> -> vector<8x32xf32>
    %c0_34 = arith.constant 0 : index
    %c0_35 = arith.constant 0 : index
    %c0_36 = arith.constant 0 : index
    %34 = vector.load %arg13[%c0_34, %c0_35, %c0_36] : memref<2x1x32xf32, #tpu.memory_space<vmem>>, vector<1x1x32xf32>
    %35 = vector.shape_cast %34 : vector<1x1x32xf32> to vector<1x32xf32>
    %36 = vector.broadcast %35 : vector<1x32xf32> to vector<8x32xf32>
    %37 = arith.addf %33, %36 : vector<8x32xf32>
    %38 = arith.negf %37 : vector<8x32xf32>
    %39 = math.exp %38 : vector<8x32xf32>
    %cst_37 = arith.constant 1.000000e+00 : f32
    %40 = vector.broadcast %cst_37 : f32 to vector<8x32xf32>
    %41 = arith.addf %40, %39 : vector<8x32xf32>
    %42 = arith.divf %40, %41 : vector<8x32xf32>
    %43 = arith.mulf %30, %42 : vector<8x32xf32>
    %44 = arith.addf %43, %13 : vector<8x32xf32>
    %cst_38 = arith.constant 0.707106769 : f32
    %45 = vector.broadcast %cst_38 : f32 to vector<8x32xf32>
    %46 = arith.mulf %44, %45 : vector<8x32xf32>
    %c0_39 = arith.constant 0 : index
    %c0_40 = arith.constant 0 : index
    %c0_41 = arith.constant 0 : index
    %47 = vector.load %arg3[%c0_39, %c0_40, %c0_41] : memref<3x8x8xf32, #tpu.memory_space<vmem>>, vector<1x8x8xf32>
    %48 = vector.shape_cast %47 : vector<1x8x8xf32> to vector<8x8xf32>
    %cst_42 = arith.constant dense<0.000000e+00> : vector<8x32xf32>
    %49 = tpu.matmul %48, %46, %cst_42 {dimension_numbers = #tpu.dot_dimension_numbers<[1], [0], [0], [1], [0, 0, 1, 1], [], []>} : vector<8x8xf32>, vector<8x32xf32>, vector<8x32xf32> -> vector<8x32xf32>
    %c1_43 = arith.constant 1 : index
    %c0_44 = arith.constant 0 : index
    %c0_45 = arith.constant 0 : index
    %50 = vector.load %arg3[%c1_43, %c0_44, %c0_45] : memref<3x8x8xf32, #tpu.memory_space<vmem>>, vector<1x8x8xf32>
    %51 = vector.shape_cast %50 : vector<1x8x8xf32> to vector<8x8xf32>
    %cst_46 = arith.constant dense<0.000000e+00> : vector<8x32xf32>
    %52 = tpu.matmul %51, %46, %cst_46 {dimension_numbers = #tpu.dot_dimension_numbers<[1], [0], [0], [1], [0, 0, 1, 1], [], []>} : vector<8x8xf32>, vector<8x32xf32>, vector<8x32xf32> -> vector<8x32xf32>
    %c2_47 = arith.constant 2 : index
    %c0_48 = arith.constant 0 : index
    %c0_49 = arith.constant 0 : index
    %53 = vector.load %arg3[%c2_47, %c0_48, %c0_49] : memref<3x8x8xf32, #tpu.memory_space<vmem>>, vector<1x8x8xf32>
    %54 = vector.shape_cast %53 : vector<1x8x8xf32> to vector<8x8xf32>
    %cst_50 = arith.constant dense<0.000000e+00> : vector<8x32xf32>
    %55 = tpu.matmul %54, %46, %cst_50 {dimension_numbers = #tpu.dot_dimension_numbers<[1], [0], [0], [1], [0, 0, 1, 1], [], []>} : vector<8x8xf32>, vector<8x32xf32>, vector<8x32xf32> -> vector<8x32xf32>
    %56 = tpu.concatenate %49, %52, %55 in 1 : vector<8x32xf32>, vector<8x32xf32>, vector<8x32xf32> -> vector<8x96xf32>
    %c1_51 = arith.constant 1 : index
    %c0_52 = arith.constant 0 : index
    %c0_53 = arith.constant 0 : index
    %57 = vector.load %arg10[%c1_51, %c0_52, %c0_53] : memref<2x96x32xf32, #tpu.memory_space<vmem>>, vector<1x96x32xf32>
    %58 = vector.shape_cast %57 : vector<1x96x32xf32> to vector<96x32xf32>
    %cst_54 = arith.constant dense<0.000000e+00> : vector<8x32xf32>
    %59 = tpu.matmul %56, %58, %cst_54 {dimension_numbers = #tpu.dot_dimension_numbers<[1], [0], [0], [1], [0, 0, 1, 1], [], []>} : vector<8x96xf32>, vector<96x32xf32>, vector<8x32xf32> -> vector<8x32xf32>
    %c1_55 = arith.constant 1 : index
    %c0_56 = arith.constant 0 : index
    %c0_57 = arith.constant 0 : index
    %60 = vector.load %arg11[%c1_55, %c0_56, %c0_57] : memref<2x1x32xf32, #tpu.memory_space<vmem>>, vector<1x1x32xf32>
    %61 = vector.shape_cast %60 : vector<1x1x32xf32> to vector<1x32xf32>
    %62 = vector.broadcast %61 : vector<1x32xf32> to vector<8x32xf32>
    %63 = arith.addf %59, %62 : vector<8x32xf32>
    %c1_58 = arith.constant 1 : index
    %c0_59 = arith.constant 0 : index
    %c0_60 = arith.constant 0 : index
    %64 = vector.load %arg12[%c1_58, %c0_59, %c0_60] : memref<2x96x32xf32, #tpu.memory_space<vmem>>, vector<1x96x32xf32>
    %65 = vector.shape_cast %64 : vector<1x96x32xf32> to vector<96x32xf32>
    %cst_61 = arith.constant dense<0.000000e+00> : vector<8x32xf32>
    %66 = tpu.matmul %56, %65, %cst_61 {dimension_numbers = #tpu.dot_dimension_numbers<[1], [0], [0], [1], [0, 0, 1, 1], [], []>} : vector<8x96xf32>, vector<96x32xf32>, vector<8x32xf32> -> vector<8x32xf32>
    %c1_62 = arith.constant 1 : index
    %c0_63 = arith.constant 0 : index
    %c0_64 = arith.constant 0 : index
    %67 = vector.load %arg13[%c1_62, %c0_63, %c0_64] : memref<2x1x32xf32, #tpu.memory_space<vmem>>, vector<1x1x32xf32>
    %68 = vector.shape_cast %67 : vector<1x1x32xf32> to vector<1x32xf32>
    %69 = vector.broadcast %68 : vector<1x32xf32> to vector<8x32xf32>
    %70 = arith.addf %66, %69 : vector<8x32xf32>
    %71 = arith.negf %70 : vector<8x32xf32>
    %72 = math.exp %71 : vector<8x32xf32>
    %cst_65 = arith.constant 1.000000e+00 : f32
    %73 = vector.broadcast %cst_65 : f32 to vector<8x32xf32>
    %74 = arith.addf %73, %72 : vector<8x32xf32>
    %75 = arith.divf %73, %74 : vector<8x32xf32>
    %76 = arith.mulf %63, %75 : vector<8x32xf32>
    %77 = arith.addf %76, %46 : vector<8x32xf32>
    %cst_66 = arith.constant 0.707106769 : f32
    %78 = vector.broadcast %cst_66 : f32 to vector<8x32xf32>
    %79 = arith.mulf %77, %78 : vector<8x32xf32>
    %c0_67 = arith.constant 0 : index
    %c0_68 = arith.constant 0 : index
    %80 = vector.load %arg14[%c0_67, %c0_68] : memref<32x32xf32, #tpu.memory_space<vmem>>, vector<32x32xf32>
    %cst_69 = arith.constant dense<0.000000e+00> : vector<8x32xf32>
    %81 = tpu.matmul %79, %80, %cst_69 {dimension_numbers = #tpu.dot_dimension_numbers<[1], [0], [0], [1], [0, 0, 1, 1], [], []>} : vector<8x32xf32>, vector<32x32xf32>, vector<8x32xf32> -> vector<8x32xf32>
    %c0_70 = arith.constant 0 : index
    %c0_71 = arith.constant 0 : index
    %82 = vector.load %arg15[%c0_70, %c0_71] : memref<1x32xf32, #tpu.memory_space<vmem>>, vector<1x32xf32>
    %83 = vector.broadcast %82 : vector<1x32xf32> to vector<8x32xf32>
    %84 = arith.addf %81, %83 : vector<8x32xf32>
    %85 = arith.addf %84, %8 : vector<8x32xf32>
    %cst_72 = arith.constant 0.707106769 : f32
    %86 = vector.broadcast %cst_72 : f32 to vector<8x32xf32>
    %87 = arith.mulf %85, %86 : vector<8x32xf32>
    %c0_73 = arith.constant 0 : index
    %c0_74 = arith.constant 0 : index
    %c0_75 = arith.constant 0 : index
    %88 = vector.load %arg2[%c0_73, %c0_74, %c0_75] : memref<1x8x4xf32, #tpu.memory_space<vmem>>, vector<1x8x4xf32>
    %89 = vector.shape_cast %88 : vector<1x8x4xf32> to vector<8x4xf32>
    %c0_76 = arith.constant 0 : index
    %c0_77 = arith.constant 0 : index
    %90 = vector.load %arg16[%c0_76, %c0_77] : memref<4x32xf32, #tpu.memory_space<vmem>>, vector<4x32xf32>
    %cst_78 = arith.constant dense<0.000000e+00> : vector<8x32xf32>
    %91 = tpu.matmul %89, %90, %cst_78 {dimension_numbers = #tpu.dot_dimension_numbers<[1], [0], [0], [1], [0, 0, 1, 1], [], []>} : vector<8x4xf32>, vector<4x32xf32>, vector<8x32xf32> -> vector<8x32xf32>
    %c0_79 = arith.constant 0 : index
    %c0_80 = arith.constant 0 : index
    %92 = vector.load %arg17[%c0_79, %c0_80] : memref<1x32xf32, #tpu.memory_space<vmem>>, vector<1x32xf32>
    %93 = vector.broadcast %92 : vector<1x32xf32> to vector<8x32xf32>
    %94 = arith.addf %91, %93 : vector<8x32xf32>
    %c0_81 = arith.constant 0 : index
    %c0_82 = arith.constant 0 : index
    %95 = vector.load %arg18[%c0_81, %c0_82] : memref<8x32xf32, #tpu.memory_space<vmem>>, vector<8x32xf32>
    %96 = arith.addf %94, %95 : vector<8x32xf32>
    %c0_83 = arith.constant 0 : index
    %c0_84 = arith.constant 0 : index
    %97 = vector.load %arg19[%c0_83, %c0_84] : memref<32x32xf32, #tpu.memory_space<vmem>>, vector<32x32xf32>
    %cst_85 = arith.constant dense<0.000000e+00> : vector<8x32xf32>
    %98 = tpu.matmul %96, %97, %cst_85 {dimension_numbers = #tpu.dot_dimension_numbers<[1], [0], [0], [1], [0, 0, 1, 1], [], []>} : vector<8x32xf32>, vector<32x32xf32>, vector<8x32xf32> -> vector<8x32xf32>
    %c0_86 = arith.constant 0 : index
    %c0_87 = arith.constant 0 : index
    %99 = vector.load %arg20[%c0_86, %c0_87] : memref<1x32xf32, #tpu.memory_space<vmem>>, vector<1x32xf32>
    %100 = vector.broadcast %99 : vector<1x32xf32> to vector<8x32xf32>
    %101 = arith.addf %98, %100 : vector<8x32xf32>
    %c0_88 = arith.constant 0 : index
    %c0_89 = arith.constant 0 : index
    %c0_90 = arith.constant 0 : index
    %102 = vector.load %arg4[%c0_88, %c0_89, %c0_90] : memref<3x8x8xf32, #tpu.memory_space<vmem>>, vector<1x8x8xf32>
    %103 = vector.shape_cast %102 : vector<1x8x8xf32> to vector<8x8xf32>
    %cst_91 = arith.constant dense<0.000000e+00> : vector<8x32xf32>
    %104 = tpu.matmul %103, %101, %cst_91 {dimension_numbers = #tpu.dot_dimension_numbers<[1], [0], [0], [1], [0, 0, 1, 1], [], []>} : vector<8x8xf32>, vector<8x32xf32>, vector<8x32xf32> -> vector<8x32xf32>
    %c1_92 = arith.constant 1 : index
    %c0_93 = arith.constant 0 : index
    %c0_94 = arith.constant 0 : index
    %105 = vector.load %arg4[%c1_92, %c0_93, %c0_94] : memref<3x8x8xf32, #tpu.memory_space<vmem>>, vector<1x8x8xf32>
    %106 = vector.shape_cast %105 : vector<1x8x8xf32> to vector<8x8xf32>
    %cst_95 = arith.constant dense<0.000000e+00> : vector<8x32xf32>
    %107 = tpu.matmul %106, %101, %cst_95 {dimension_numbers = #tpu.dot_dimension_numbers<[1], [0], [0], [1], [0, 0, 1, 1], [], []>} : vector<8x8xf32>, vector<8x32xf32>, vector<8x32xf32> -> vector<8x32xf32>
    %c2_96 = arith.constant 2 : index
    %c0_97 = arith.constant 0 : index
    %c0_98 = arith.constant 0 : index
    %108 = vector.load %arg4[%c2_96, %c0_97, %c0_98] : memref<3x8x8xf32, #tpu.memory_space<vmem>>, vector<1x8x8xf32>
    %109 = vector.shape_cast %108 : vector<1x8x8xf32> to vector<8x8xf32>
    %cst_99 = arith.constant dense<0.000000e+00> : vector<8x32xf32>
    %110 = tpu.matmul %109, %101, %cst_99 {dimension_numbers = #tpu.dot_dimension_numbers<[1], [0], [0], [1], [0, 0, 1, 1], [], []>} : vector<8x8xf32>, vector<8x32xf32>, vector<8x32xf32> -> vector<8x32xf32>
    %111 = tpu.concatenate %104, %107, %110 in 1 : vector<8x32xf32>, vector<8x32xf32>, vector<8x32xf32> -> vector<8x96xf32>
    %c0_100 = arith.constant 0 : index
    %c0_101 = arith.constant 0 : index
    %c0_102 = arith.constant 0 : index
    %112 = vector.load %arg21[%c0_100, %c0_101, %c0_102] : memref<2x96x32xf32, #tpu.memory_space<vmem>>, vector<1x96x32xf32>
    %113 = vector.shape_cast %112 : vector<1x96x32xf32> to vector<96x32xf32>
    %cst_103 = arith.constant dense<0.000000e+00> : vector<8x32xf32>
    %114 = tpu.matmul %111, %113, %cst_103 {dimension_numbers = #tpu.dot_dimension_numbers<[1], [0], [0], [1], [0, 0, 1, 1], [], []>} : vector<8x96xf32>, vector<96x32xf32>, vector<8x32xf32> -> vector<8x32xf32>
    %c0_104 = arith.constant 0 : index
    %c0_105 = arith.constant 0 : index
    %c0_106 = arith.constant 0 : index
    %115 = vector.load %arg22[%c0_104, %c0_105, %c0_106] : memref<2x1x32xf32, #tpu.memory_space<vmem>>, vector<1x1x32xf32>
    %116 = vector.shape_cast %115 : vector<1x1x32xf32> to vector<1x32xf32>
    %117 = vector.broadcast %116 : vector<1x32xf32> to vector<8x32xf32>
    %118 = arith.addf %114, %117 : vector<8x32xf32>
    %c0_107 = arith.constant 0 : index
    %c0_108 = arith.constant 0 : index
    %c0_109 = arith.constant 0 : index
    %119 = vector.load %arg23[%c0_107, %c0_108, %c0_109] : memref<2x96x32xf32, #tpu.memory_space<vmem>>, vector<1x96x32xf32>
    %120 = vector.shape_cast %119 : vector<1x96x32xf32> to vector<96x32xf32>
    %cst_110 = arith.constant dense<0.000000e+00> : vector<8x32xf32>
    %121 = tpu.matmul %111, %120, %cst_110 {dimension_numbers = #tpu.dot_dimension_numbers<[1], [0], [0], [1], [0, 0, 1, 1], [], []>} : vector<8x96xf32>, vector<96x32xf32>, vector<8x32xf32> -> vector<8x32xf32>
    %c0_111 = arith.constant 0 : index
    %c0_112 = arith.constant 0 : index
    %c0_113 = arith.constant 0 : index
    %122 = vector.load %arg24[%c0_111, %c0_112, %c0_113] : memref<2x1x32xf32, #tpu.memory_space<vmem>>, vector<1x1x32xf32>
    %123 = vector.shape_cast %122 : vector<1x1x32xf32> to vector<1x32xf32>
    %124 = vector.broadcast %123 : vector<1x32xf32> to vector<8x32xf32>
    %125 = arith.addf %121, %124 : vector<8x32xf32>
    %126 = arith.negf %125 : vector<8x32xf32>
    %127 = math.exp %126 : vector<8x32xf32>
    %cst_114 = arith.constant 1.000000e+00 : f32
    %128 = vector.broadcast %cst_114 : f32 to vector<8x32xf32>
    %129 = arith.addf %128, %127 : vector<8x32xf32>
    %130 = arith.divf %128, %129 : vector<8x32xf32>
    %131 = arith.mulf %118, %130 : vector<8x32xf32>
    %c0_115 = arith.constant 0 : index
    %c0_116 = arith.constant 0 : index
    %132 = vector.load %arg25[%c0_115, %c0_116] : memref<32x32xf32, #tpu.memory_space<vmem>>, vector<32x32xf32>
    %cst_117 = arith.constant dense<0.000000e+00> : vector<8x32xf32>
    %133 = tpu.matmul %131, %132, %cst_117 {dimension_numbers = #tpu.dot_dimension_numbers<[1], [0], [0], [1], [0, 0, 1, 1], [], []>} : vector<8x32xf32>, vector<32x32xf32>, vector<8x32xf32> -> vector<8x32xf32>
    %c0_118 = arith.constant 0 : index
    %c0_119 = arith.constant 0 : index
    %134 = vector.load %arg26[%c0_118, %c0_119] : memref<1x32xf32, #tpu.memory_space<vmem>>, vector<1x32xf32>
    %135 = vector.broadcast %134 : vector<1x32xf32> to vector<8x32xf32>
    %136 = arith.addf %133, %135 : vector<8x32xf32>
    %137 = arith.addf %136, %96 : vector<8x32xf32>
    %cst_120 = arith.constant 0.707106769 : f32
    %138 = vector.broadcast %cst_120 : f32 to vector<8x32xf32>
    %139 = arith.mulf %137, %138 : vector<8x32xf32>
    %cst_121 = arith.constant dense<0.000000e+00> : vector<8x8xf32>
    %140 = tpu.matmul %139, %84, %cst_121 {dimension_numbers = #tpu.dot_dimension_numbers<[1], [1], [0], [0], [0, 0, 1, 0], [], []>} : vector<8x32xf32>, vector<8x32xf32>, vector<8x8xf32> -> vector<8x8xf32>
    %cst_122 = arith.constant dense<0xFF800000> : vector<8xf32>
    %141 = vector.multi_reduction <maximumf>, %140, %cst_122 [1] : vector<8x8xf32> to vector<8xf32>
    %142 = vector.shape_cast %141 : vector<8xf32> to vector<8x1xf32>
    %143 = vector.broadcast %142 : vector<8x1xf32> to vector<8x8xf32>
    %144 = arith.subf %140, %143 : vector<8x8xf32>
    %145 = math.exp %144 : vector<8x8xf32>
    %cst_123 = arith.constant dense<0.000000e+00> : vector<8xf32>
    %146 = vector.multi_reduction <add>, %145, %cst_123 [1] : vector<8x8xf32> to vector<8xf32>
    %147 = vector.shape_cast %146 : vector<8xf32> to vector<8x1xf32>
    %148 = tpu.reciprocal %147 {approx = true} : vector<8x1xf32> -> vector<8x1xf32>
    %149 = vector.broadcast %148 : vector<8x1xf32> to vector<8x8xf32>
    %150 = arith.mulf %145, %149 : vector<8x8xf32>
    %cst_124 = arith.constant dense<0.000000e+00> : vector<8x32xf32>
    %151 = tpu.matmul %150, %87, %cst_124 {dimension_numbers = #tpu.dot_dimension_numbers<[1], [0], [0], [1], [0, 0, 1, 1], [], []>} : vector<8x8xf32>, vector<8x32xf32>, vector<8x32xf32> -> vector<8x32xf32>
    %c0_125 = arith.constant 0 : index
    %c0_126 = arith.constant 0 : index
    %152 = vector.load %arg27[%c0_125, %c0_126] : memref<32x32xf32, #tpu.memory_space<vmem>>, vector<32x32xf32>
    %cst_127 = arith.constant dense<0.000000e+00> : vector<8x32xf32>
    %153 = tpu.matmul %151, %152, %cst_127 {dimension_numbers = #tpu.dot_dimension_numbers<[1], [0], [0], [1], [0, 0, 1, 1], [], []>} : vector<8x32xf32>, vector<32x32xf32>, vector<8x32xf32> -> vector<8x32xf32>
    %c0_128 = arith.constant 0 : index
    %c0_129 = arith.constant 0 : index
    %154 = vector.load %arg28[%c0_128, %c0_129] : memref<1x32xf32, #tpu.memory_space<vmem>>, vector<1x32xf32>
    %155 = vector.broadcast %154 : vector<1x32xf32> to vector<8x32xf32>
    %156 = arith.addf %153, %155 : vector<8x32xf32>
    %157 = arith.addf %131, %156 : vector<8x32xf32>
    %cst_130 = arith.constant 0.707106769 : f32
    %158 = vector.broadcast %cst_130 : f32 to vector<8x32xf32>
    %159 = arith.mulf %157, %158 : vector<8x32xf32>
    %160 = arith.addf %159, %101 : vector<8x32xf32>
    %cst_131 = arith.constant 0.707106769 : f32
    %161 = vector.broadcast %cst_131 : f32 to vector<8x32xf32>
    %162 = arith.mulf %160, %161 : vector<8x32xf32>
    %c0_132 = arith.constant 0 : index
    %c0_133 = arith.constant 0 : index
    %c0_134 = arith.constant 0 : index
    %163 = vector.load %arg4[%c0_132, %c0_133, %c0_134] : memref<3x8x8xf32, #tpu.memory_space<vmem>>, vector<1x8x8xf32>
    %164 = vector.shape_cast %163 : vector<1x8x8xf32> to vector<8x8xf32>
    %cst_135 = arith.constant dense<0.000000e+00> : vector<8x32xf32>
    %165 = tpu.matmul %164, %162, %cst_135 {dimension_numbers = #tpu.dot_dimension_numbers<[1], [0], [0], [1], [0, 0, 1, 1], [], []>} : vector<8x8xf32>, vector<8x32xf32>, vector<8x32xf32> -> vector<8x32xf32>
    %c1_136 = arith.constant 1 : index
    %c0_137 = arith.constant 0 : index
    %c0_138 = arith.constant 0 : index
    %166 = vector.load %arg4[%c1_136, %c0_137, %c0_138] : memref<3x8x8xf32, #tpu.memory_space<vmem>>, vector<1x8x8xf32>
    %167 = vector.shape_cast %166 : vector<1x8x8xf32> to vector<8x8xf32>
    %cst_139 = arith.constant dense<0.000000e+00> : vector<8x32xf32>
    %168 = tpu.matmul %167, %162, %cst_139 {dimension_numbers = #tpu.dot_dimension_numbers<[1], [0], [0], [1], [0, 0, 1, 1], [], []>} : vector<8x8xf32>, vector<8x32xf32>, vector<8x32xf32> -> vector<8x32xf32>
    %c2_140 = arith.constant 2 : index
    %c0_141 = arith.constant 0 : index
    %c0_142 = arith.constant 0 : index
    %169 = vector.load %arg4[%c2_140, %c0_141, %c0_142] : memref<3x8x8xf32, #tpu.memory_space<vmem>>, vector<1x8x8xf32>
    %170 = vector.shape_cast %169 : vector<1x8x8xf32> to vector<8x8xf32>
    %cst_143 = arith.constant dense<0.000000e+00> : vector<8x32xf32>
    %171 = tpu.matmul %170, %162, %cst_143 {dimension_numbers = #tpu.dot_dimension_numbers<[1], [0], [0], [1], [0, 0, 1, 1], [], []>} : vector<8x8xf32>, vector<8x32xf32>, vector<8x32xf32> -> vector<8x32xf32>
    %172 = tpu.concatenate %165, %168, %171 in 1 : vector<8x32xf32>, vector<8x32xf32>, vector<8x32xf32> -> vector<8x96xf32>
    %c1_144 = arith.constant 1 : index
    %c0_145 = arith.constant 0 : index
    %c0_146 = arith.constant 0 : index
    %173 = vector.load %arg21[%c1_144, %c0_145, %c0_146] : memref<2x96x32xf32, #tpu.memory_space<vmem>>, vector<1x96x32xf32>
    %174 = vector.shape_cast %173 : vector<1x96x32xf32> to vector<96x32xf32>
    %cst_147 = arith.constant dense<0.000000e+00> : vector<8x32xf32>
    %175 = tpu.matmul %172, %174, %cst_147 {dimension_numbers = #tpu.dot_dimension_numbers<[1], [0], [0], [1], [0, 0, 1, 1], [], []>} : vector<8x96xf32>, vector<96x32xf32>, vector<8x32xf32> -> vector<8x32xf32>
    %c1_148 = arith.constant 1 : index
    %c0_149 = arith.constant 0 : index
    %c0_150 = arith.constant 0 : index
    %176 = vector.load %arg22[%c1_148, %c0_149, %c0_150] : memref<2x1x32xf32, #tpu.memory_space<vmem>>, vector<1x1x32xf32>
    %177 = vector.shape_cast %176 : vector<1x1x32xf32> to vector<1x32xf32>
    %178 = vector.broadcast %177 : vector<1x32xf32> to vector<8x32xf32>
    %179 = arith.addf %175, %178 : vector<8x32xf32>
    %c1_151 = arith.constant 1 : index
    %c0_152 = arith.constant 0 : index
    %c0_153 = arith.constant 0 : index
    %180 = vector.load %arg23[%c1_151, %c0_152, %c0_153] : memref<2x96x32xf32, #tpu.memory_space<vmem>>, vector<1x96x32xf32>
    %181 = vector.shape_cast %180 : vector<1x96x32xf32> to vector<96x32xf32>
    %cst_154 = arith.constant dense<0.000000e+00> : vector<8x32xf32>
    %182 = tpu.matmul %172, %181, %cst_154 {dimension_numbers = #tpu.dot_dimension_numbers<[1], [0], [0], [1], [0, 0, 1, 1], [], []>} : vector<8x96xf32>, vector<96x32xf32>, vector<8x32xf32> -> vector<8x32xf32>
    %c1_155 = arith.constant 1 : index
    %c0_156 = arith.constant 0 : index
    %c0_157 = arith.constant 0 : index
    %183 = vector.load %arg24[%c1_155, %c0_156, %c0_157] : memref<2x1x32xf32, #tpu.memory_space<vmem>>, vector<1x1x32xf32>
    %184 = vector.shape_cast %183 : vector<1x1x32xf32> to vector<1x32xf32>
    %185 = vector.broadcast %184 : vector<1x32xf32> to vector<8x32xf32>
    %186 = arith.addf %182, %185 : vector<8x32xf32>
    %187 = arith.negf %186 : vector<8x32xf32>
    %188 = math.exp %187 : vector<8x32xf32>
    %cst_158 = arith.constant 1.000000e+00 : f32
    %189 = vector.broadcast %cst_158 : f32 to vector<8x32xf32>
    %190 = arith.addf %189, %188 : vector<8x32xf32>
    %191 = arith.divf %189, %190 : vector<8x32xf32>
    %192 = arith.mulf %179, %191 : vector<8x32xf32>
    %c0_159 = arith.constant 0 : index
    %c0_160 = arith.constant 0 : index
    %193 = vector.load %arg25[%c0_159, %c0_160] : memref<32x32xf32, #tpu.memory_space<vmem>>, vector<32x32xf32>
    %cst_161 = arith.constant dense<0.000000e+00> : vector<8x32xf32>
    %194 = tpu.matmul %192, %193, %cst_161 {dimension_numbers = #tpu.dot_dimension_numbers<[1], [0], [0], [1], [0, 0, 1, 1], [], []>} : vector<8x32xf32>, vector<32x32xf32>, vector<8x32xf32> -> vector<8x32xf32>
    %c0_162 = arith.constant 0 : index
    %c0_163 = arith.constant 0 : index
    %195 = vector.load %arg26[%c0_162, %c0_163] : memref<1x32xf32, #tpu.memory_space<vmem>>, vector<1x32xf32>
    %196 = vector.broadcast %195 : vector<1x32xf32> to vector<8x32xf32>
    %197 = arith.addf %194, %196 : vector<8x32xf32>
    %198 = arith.addf %197, %96 : vector<8x32xf32>
    %cst_164 = arith.constant 0.707106769 : f32
    %199 = vector.broadcast %cst_164 : f32 to vector<8x32xf32>
    %200 = arith.mulf %198, %199 : vector<8x32xf32>
    %cst_165 = arith.constant dense<0.000000e+00> : vector<8x8xf32>
    %201 = tpu.matmul %200, %84, %cst_165 {dimension_numbers = #tpu.dot_dimension_numbers<[1], [1], [0], [0], [0, 0, 1, 0], [], []>} : vector<8x32xf32>, vector<8x32xf32>, vector<8x8xf32> -> vector<8x8xf32>
    %cst_166 = arith.constant dense<0xFF800000> : vector<8xf32>
    %202 = vector.multi_reduction <maximumf>, %201, %cst_166 [1] : vector<8x8xf32> to vector<8xf32>
    %203 = vector.shape_cast %202 : vector<8xf32> to vector<8x1xf32>
    %204 = vector.broadcast %203 : vector<8x1xf32> to vector<8x8xf32>
    %205 = arith.subf %201, %204 : vector<8x8xf32>
    %206 = math.exp %205 : vector<8x8xf32>
    %cst_167 = arith.constant dense<0.000000e+00> : vector<8xf32>
    %207 = vector.multi_reduction <add>, %206, %cst_167 [1] : vector<8x8xf32> to vector<8xf32>
    %208 = vector.shape_cast %207 : vector<8xf32> to vector<8x1xf32>
    %209 = tpu.reciprocal %208 {approx = true} : vector<8x1xf32> -> vector<8x1xf32>
    %210 = vector.broadcast %209 : vector<8x1xf32> to vector<8x8xf32>
    %211 = arith.mulf %206, %210 : vector<8x8xf32>
    %cst_168 = arith.constant dense<0.000000e+00> : vector<8x32xf32>
    %212 = tpu.matmul %211, %87, %cst_168 {dimension_numbers = #tpu.dot_dimension_numbers<[1], [0], [0], [1], [0, 0, 1, 1], [], []>} : vector<8x8xf32>, vector<8x32xf32>, vector<8x32xf32> -> vector<8x32xf32>
    %c0_169 = arith.constant 0 : index
    %c0_170 = arith.constant 0 : index
    %213 = vector.load %arg27[%c0_169, %c0_170] : memref<32x32xf32, #tpu.memory_space<vmem>>, vector<32x32xf32>
    %cst_171 = arith.constant dense<0.000000e+00> : vector<8x32xf32>
    %214 = tpu.matmul %212, %213, %cst_171 {dimension_numbers = #tpu.dot_dimension_numbers<[1], [0], [0], [1], [0, 0, 1, 1], [], []>} : vector<8x32xf32>, vector<32x32xf32>, vector<8x32xf32> -> vector<8x32xf32>
    %c0_172 = arith.constant 0 : index
    %c0_173 = arith.constant 0 : index
    %215 = vector.load %arg28[%c0_172, %c0_173] : memref<1x32xf32, #tpu.memory_space<vmem>>, vector<1x32xf32>
    %216 = vector.broadcast %215 : vector<1x32xf32> to vector<8x32xf32>
    %217 = arith.addf %214, %216 : vector<8x32xf32>
    %218 = arith.addf %192, %217 : vector<8x32xf32>
    %cst_174 = arith.constant 0.707106769 : f32
    %219 = vector.broadcast %cst_174 : f32 to vector<8x32xf32>
    %220 = arith.mulf %218, %219 : vector<8x32xf32>
    %221 = arith.addf %220, %162 : vector<8x32xf32>
    %cst_175 = arith.constant 0.707106769 : f32
    %222 = vector.broadcast %cst_175 : f32 to vector<8x32xf32>
    %223 = arith.mulf %221, %222 : vector<8x32xf32>
    %c0_176 = arith.constant 0 : index
    %c0_177 = arith.constant 0 : index
    %224 = vector.load %arg29[%c0_176, %c0_177] : memref<32x32xf32, #tpu.memory_space<vmem>>, vector<32x32xf32>
    %cst_178 = arith.constant dense<0.000000e+00> : vector<8x32xf32>
    %225 = tpu.matmul %223, %224, %cst_178 {dimension_numbers = #tpu.dot_dimension_numbers<[1], [0], [0], [1], [0, 0, 1, 1], [], []>} : vector<8x32xf32>, vector<32x32xf32>, vector<8x32xf32> -> vector<8x32xf32>
    %c0_179 = arith.constant 0 : index
    %c0_180 = arith.constant 0 : index
    %226 = vector.load %arg30[%c0_179, %c0_180] : memref<1x32xf32, #tpu.memory_space<vmem>>, vector<1x32xf32>
    %227 = vector.broadcast %226 : vector<1x32xf32> to vector<8x32xf32>
    %228 = arith.addf %225, %227 : vector<8x32xf32>
    %c0_181 = arith.constant 0 : index
    %c0_182 = arith.constant 0 : index
    %229 = vector.load %arg31[%c0_181, %c0_182] : memref<32x128xf32, #tpu.memory_space<vmem>>, vector<32x128xf32>
    %cst_183 = arith.constant dense<0.000000e+00> : vector<8x128xf32>
    %230 = tpu.matmul %228, %229, %cst_183 {dimension_numbers = #tpu.dot_dimension_numbers<[1], [0], [0], [1], [0, 0, 1, 1], [], []>} : vector<8x32xf32>, vector<32x128xf32>, vector<8x128xf32> -> vector<8x128xf32>
    %c0_184 = arith.constant 0 : index
    %c0_185 = arith.constant 0 : index
    %231 = vector.load %arg32[%c0_184, %c0_185] : memref<1x128xf32, #tpu.memory_space<vmem>>, vector<1x128xf32>
    %232 = vector.broadcast %231 : vector<1x128xf32> to vector<8x128xf32>
    %233 = arith.addf %230, %232 : vector<8x128xf32>
    %c0_186 = arith.constant 0 : index
    %c0_187 = arith.constant 0 : index
    %c0_188 = arith.constant 0 : index
    %234 = vector.load %arg33[%c0_186, %c0_187, %c0_188] : memref<1x8x128xf32, #tpu.memory_space<vmem>>, vector<1x8x128xf32>
    %235 = vector.shape_cast %234 : vector<1x8x128xf32> to vector<8x128xf32>
    %236 = vector.shape_cast %233 : vector<8x128xf32> to vector<1x8x128xf32>
    tpu.vector_store %arg33[%c0_186, %c0_187, %c0_188], %236 {strides = array<i32>} : memref<1x8x128xf32, #tpu.memory_space<vmem>>, vector<1x8x128xf32>,
    return
  }
  func.func @transform_0(%arg0: i32) -> (i32, i32, i32) {
    %c0_i32 = arith.constant 0 : i32
    %c0_i32_0 = arith.constant 0 : i32
    %c0_i32_1 = arith.constant 0 : i32
    return %arg0, %c0_i32, %c0_i32_0 : i32, i32, i32
  }
  func.func @transform_1(%arg0: i32) -> (i32, i32, i32) {
    %c0_i32 = arith.constant 0 : i32
    %c0_i32_0 = arith.constant 0 : i32
    %c0_i32_1 = arith.constant 0 : i32
    return %arg0, %c0_i32, %c0_i32_0 : i32, i32, i32
  }
  func.func @transform_2(%arg0: i32) -> (i32, i32, i32) {
    %c0_i32 = arith.constant 0 : i32
    %c0_i32_0 = arith.constant 0 : i32
    %c0_i32_1 = arith.constant 0 : i32
    %c0_i32_2 = arith.constant 0 : i32
    return %c0_i32, %c0_i32_0, %c0_i32_1 : i32, i32, i32
  }
  func.func @transform_3(%arg0: i32) -> (i32, i32, i32) {
    %c0_i32 = arith.constant 0 : i32
    %c0_i32_0 = arith.constant 0 : i32
    %c0_i32_1 = arith.constant 0 : i32
    %c0_i32_2 = arith.constant 0 : i32
    return %c0_i32, %c0_i32_0, %c0_i32_1 : i32, i32, i32
  }
  func.func @transform_4(%arg0: i32) -> (i32, i32) {
    %c0_i32 = arith.constant 0 : i32
    %c0_i32_0 = arith.constant 0 : i32
    %c0_i32_1 = arith.constant 0 : i32
    return %c0_i32, %c0_i32_0 : i32, i32
  }
  func.func @transform_5(%arg0: i32) -> (i32, i32) {
    %c0_i32 = arith.constant 0 : i32
    %c0_i32_0 = arith.constant 0 : i32
    %c0_i32_1 = arith.constant 0 : i32
    return %c0_i32, %c0_i32_0 : i32, i32
  }
  func.func @transform_6(%arg0: i32) -> (i32, i32) {
    %c0_i32 = arith.constant 0 : i32
    %c0_i32_0 = arith.constant 0 : i32
    %c0_i32_1 = arith.constant 0 : i32
    return %c0_i32, %c0_i32_0 : i32, i32
  }
  func.func @transform_7(%arg0: i32) -> (i32, i32) {
    %c0_i32 = arith.constant 0 : i32
    %c0_i32_0 = arith.constant 0 : i32
    %c0_i32_1 = arith.constant 0 : i32
    return %c0_i32, %c0_i32_0 : i32, i32
  }
  func.func @transform_8(%arg0: i32) -> (i32, i32) {
    %c0_i32 = arith.constant 0 : i32
    %c0_i32_0 = arith.constant 0 : i32
    %c0_i32_1 = arith.constant 0 : i32
    return %c0_i32, %c0_i32_0 : i32, i32
  }
  func.func @transform_9(%arg0: i32) -> (i32, i32, i32) {
    %c0_i32 = arith.constant 0 : i32
    %c0_i32_0 = arith.constant 0 : i32
    %c0_i32_1 = arith.constant 0 : i32
    %c0_i32_2 = arith.constant 0 : i32
    return %c0_i32, %c0_i32_0, %c0_i32_1 : i32, i32, i32
  }
  func.func @transform_10(%arg0: i32) -> (i32, i32, i32) {
    %c0_i32 = arith.constant 0 : i32
    %c0_i32_0 = arith.constant 0 : i32
    %c0_i32_1 = arith.constant 0 : i32
    %c0_i32_2 = arith.constant 0 : i32
    return %c0_i32, %c0_i32_0, %c0_i32_1 : i32, i32, i32
  }
  func.func @transform_11(%arg0: i32) -> (i32, i32, i32) {
    %c0_i32 = arith.constant 0 : i32
    %c0_i32_0 = arith.constant 0 : i32
    %c0_i32_1 = arith.constant 0 : i32
    %c0_i32_2 = arith.constant 0 : i32
    return %c0_i32, %c0_i32_0, %c0_i32_1 : i32, i32, i32
  }
  func.func @transform_12(%arg0: i32) -> (i32, i32, i32) {
    %c0_i32 = arith.constant 0 : i32
    %c0_i32_0 = arith.constant 0 : i32
    %c0_i32_1 = arith.constant 0 : i32
    %c0_i32_2 = arith.constant 0 : i32
    return %c0_i32, %c0_i32_0, %c0_i32_1 : i32, i32, i32
  }
  func.func @transform_13(%arg0: i32) -> (i32, i32) {
    %c0_i32 = arith.constant 0 : i32
    %c0_i32_0 = arith.constant 0 : i32
    %c0_i32_1 = arith.constant 0 : i32
    return %c0_i32, %c0_i32_0 : i32, i32
  }
  func.func @transform_14(%arg0: i32) -> (i32, i32) {
    %c0_i32 = arith.constant 0 : i32
    %c0_i32_0 = arith.constant 0 : i32
    %c0_i32_1 = arith.constant 0 : i32
    return %c0_i32, %c0_i32_0 : i32, i32
  }
  func.func @transform_15(%arg0: i32) -> (i32, i32) {
    %c0_i32 = arith.constant 0 : i32
    %c0_i32_0 = arith.constant 0 : i32
    %c0_i32_1 = arith.constant 0 : i32
    return %c0_i32, %c0_i32_0 : i32, i32
  }
  func.func @transform_16(%arg0: i32) -> (i32, i32) {
    %c0_i32 = arith.constant 0 : i32
    %c0_i32_0 = arith.constant 0 : i32
    %c0_i32_1 = arith.constant 0 : i32
    return %c0_i32, %c0_i32_0 : i32, i32
  }
  func.func @transform_17(%arg0: i32) -> (i32, i32) {
    %c0_i32 = arith.constant 0 : i32
    %c0_i32_0 = arith.constant 0 : i32
    %c0_i32_1 = arith.constant 0 : i32
    return %c0_i32, %c0_i32_0 : i32, i32
  }
  func.func @transform_18(%arg0: i32) -> (i32, i32) {
    %c0_i32 = arith.constant 0 : i32
    %c0_i32_0 = arith.constant 0 : i32
    %c0_i32_1 = arith.constant 0 : i32
    return %c0_i32, %c0_i32_0 : i32, i32
  }
  func.func @transform_19(%arg0: i32) -> (i32, i32) {
    %c0_i32 = arith.constant 0 : i32
    %c0_i32_0 = arith.constant 0 : i32
    %c0_i32_1 = arith.constant 0 : i32
    return %c0_i32, %c0_i32_0 : i32, i32
  }
  func.func @transform_20(%arg0: i32) -> (i32, i32, i32) {
    %c0_i32 = arith.constant 0 : i32
    %c0_i32_0 = arith.constant 0 : i32
    %c0_i32_1 = arith.constant 0 : i32
    %c0_i32_2 = arith.constant 0 : i32
    return %c0_i32, %c0_i32_0, %c0_i32_1 : i32, i32, i32
  }
  func.func @transform_21(%arg0: i32) -> (i32, i32, i32) {
    %c0_i32 = arith.constant 0 : i32
    %c0_i32_0 = arith.constant 0 : i32
    %c0_i32_1 = arith.constant 0 : i32
    %c0_i32_2 = arith.constant 0 : i32
    return %c0_i32, %c0_i32_0, %c0_i32_1 : i32, i32, i32
  }
  func.func @transform_22(%arg0: i32) -> (i32, i32, i32) {
    %c0_i32 = arith.constant 0 : i32
    %c0_i32_0 = arith.constant 0 : i32
    %c0_i32_1 = arith.constant 0 : i32
    %c0_i32_2 = arith.constant 0 : i32
    return %c0_i32, %c0_i32_0, %c0_i32_1 : i32, i32, i32
  }
  func.func @transform_23(%arg0: i32) -> (i32, i32, i32) {
    %c0_i32 = arith.constant 0 : i32
    %c0_i32_0 = arith.constant 0 : i32
    %c0_i32_1 = arith.constant 0 : i32
    %c0_i32_2 = arith.constant 0 : i32
    return %c0_i32, %c0_i32_0, %c0_i32_1 : i32, i32, i32
  }
  func.func @transform_24(%arg0: i32) -> (i32, i32) {
    %c0_i32 = arith.constant 0 : i32
    %c0_i32_0 = arith.constant 0 : i32
    %c0_i32_1 = arith.constant 0 : i32
    return %c0_i32, %c0_i32_0 : i32, i32
  }
  func.func @transform_25(%arg0: i32) -> (i32, i32) {
    %c0_i32 = arith.constant 0 : i32
    %c0_i32_0 = arith.constant 0 : i32
    %c0_i32_1 = arith.constant 0 : i32
    return %c0_i32, %c0_i32_0 : i32, i32
  }
  func.func @transform_26(%arg0: i32) -> (i32, i32) {
    %c0_i32 = arith.constant 0 : i32
    %c0_i32_0 = arith.constant 0 : i32
    %c0_i32_1 = arith.constant 0 : i32
    return %c0_i32, %c0_i32_0 : i32, i32
  }
  func.func @transform_27(%arg0: i32) -> (i32, i32) {
    %c0_i32 = arith.constant 0 : i32
    %c0_i32_0 = arith.constant 0 : i32
    %c0_i32_1 = arith.constant 0 : i32
    return %c0_i32, %c0_i32_0 : i32, i32
  }
  func.func @transform_28(%arg0: i32) -> (i32, i32) {
    %c0_i32 = arith.constant 0 : i32
    %c0_i32_0 = arith.constant 0 : i32
    %c0_i32_1 = arith.constant 0 : i32
    return %c0_i32, %c0_i32_0 : i32, i32
  }
  func.func @transform_29(%arg0: i32) -> (i32, i32) {
    %c0_i32 = arith.constant 0 : i32
    %c0_i32_0 = arith.constant 0 : i32
    %c0_i32_1 = arith.constant 0 : i32
    return %c0_i32, %c0_i32_0 : i32, i32
  }
  func.func @transform_30(%arg0: i32) -> (i32, i32) {
    %c0_i32 = arith.constant 0 : i32
    %c0_i32_0 = arith.constant 0 : i32
    %c0_i32_1 = arith.constant 0 : i32
    return %c0_i32, %c0_i32_0 : i32, i32
  }
  func.func @transform_31(%arg0: i32) -> (i32, i32) {
    %c0_i32 = arith.constant 0 : i32
    %c0_i32_0 = arith.constant 0 : i32
    %c0_i32_1 = arith.constant 0 : i32
    return %c0_i32, %c0_i32_0 : i32, i32
  }
  func.func @transform_32(%arg0: i32) -> (i32, i32, i32) {
    %c0_i32 = arith.constant 0 : i32
    %c0_i32_0 = arith.constant 0 : i32
    %c0_i32_1 = arith.constant 0 : i32
    return %arg0, %c0_i32, %c0_i32_0 : i32, i32, i32
  }
}

</mosaic_0001>

<bundles_post_ra>
// kernel: seq2seq_forward.1
= control target key start
LH: loop header
LB: loop body
LE: loop exit
PB: predicated region body
PF: predicated region fallthrough
CT: control target
= control target key end

     0   :  { %s3118_s6 = smov 1   ;;  %s3119_s10 = smov 2   ;;  %s3721_s0 = inlined_call_operand.smem [shape: u32[33], index: -1, kind: input, shape index: {}] }
   0x1   :  { %s3172_s5 = sld [smem:[%s3721_s0]]   ;;  %s3120_s14 = smov 3  }
   0x2   :  { %s3177_s9 = sld [smem:[%s3721_s0 + %s3118_s6]]   ;;  %s3121_s18 = smov 4  }
   0x3   :  { %s3182_s13 = sld [smem:[%s3721_s0 + %s3119_s10]]   ;;  %s3122_s22 = smov 5  }
   0x4   :  { %s3187_s17 = sld [smem:[%s3721_s0 + %s3120_s14]]   ;;  %s3123_s26 = smov 6  }
   0x5   :  { %s3192_s21 = sld [smem:[%s3721_s0 + %s3121_s18]]   ;;  %s3124_s30 = smov 7  }
   0x6   :  { %s3197_s25 = sld [smem:[%s3721_s0 + %s3122_s22]]   ;;  %s3125_s4 = smov 8  }
   0x7   :  { %s3202_s29 = sld [smem:[%s3721_s0 + %s3123_s26]]   ;;  %s3126_s10 = smov 9  }
   0x8   :  { %3733 = sst [smem:[#allocation24_spill]] %s3177_s9  ;;  %s3127_s15 = smov 10  }
   0x9   :  { %s3207_s3 = sld [smem:[%s3721_s0 + %s3124_s30]]   ;;  %s3128_s20 = smov 11  }
   0xa   :  { %3734 = sst [smem:[#allocation25_spill]] %s3187_s17  ;;  %s3129_s26 = smov 12  }
   0xb   :  { %s3212_s8 = sld [smem:[%s3721_s0 + %s3125_s4]]   ;;  %s3130_s1 = smov 13  }
   0xc   :  { %s3217_s14 = sld [smem:[%s3721_s0 + %s3126_s10]]   ;;  %s3131_s7 = smov 14  }
   0xd   :  { %s3222_s19 = sld [smem:[%s3721_s0 + %s3127_s15]]   ;;  %s3132_s15 = smov 15  }
   0xe   :  { %s3227_s24 = sld [smem:[%s3721_s0 + %s3128_s20]]   ;;  %s3133_s22 = smov 16  }
   0xf   :  { %s3232_s30 = sld [smem:[%s3721_s0 + %s3129_s26]]   ;;  %s3134_s28 = smov 17  }
  0x10   :  { %s3237_s6 = sld [smem:[%s3721_s0 + %s3130_s1]]  }
  0x11   :  { %3735 = sst [smem:[#allocation26_spill]] %s3212_s8 }
  0x12   :  { %s3242_s12 = sld [smem:[%s3721_s0 + %s3131_s7]]   ;;  %s3135_s7 = smov 18  }
  0x13   :  { %s3247_s20 = sld [smem:[%s3721_s0 + %s3132_s15]]   ;;  %s3136_s15 = smov 19  }
  0x14   :  { %3736 = sst [smem:[#allocation27_spill]] %s3227_s24 }
  0x15   :  { %s3252_s27 = sld [smem:[%s3721_s0 + %s3133_s22]]   ;;  %s3137_s22 = smov 20  }
  0x16   :  { %3737 = sst [smem:[#allocation28_spill]] %s3237_s6 }
  0x17   :  { %s3257_s4 = sld [smem:[%s3721_s0 + %s3134_s28]]   ;;  %s3138_s28 = smov 21  }
  0x18   :  { %s3262_s17 = sld [smem:[%s3721_s0 + %s3135_s7]]   ;;  %s3139_s7 = smov 22  }
  0x19   :  { %3738 = sst [smem:[#allocation29_spill]] %s3247_s20 }
  0x1a   :  { %s3267_s6 = sld [smem:[%s3721_s0 + %s3136_s15]]   ;;  %s3140_s15 = smov 23  }
  0x1b   :  { %3739 = sst [smem:[#allocation30_spill]] %s3252_s27 }
  0x1c   :  { %s3272_s27 = sld [smem:[%s3721_s0 + %s3137_s22]]   ;;  %s3141_s22 = smov 24  }
  0x1d   :  { %3740 = sst [smem:[#allocation31_spill]] %s3257_s4 }
  0x1e   :  { %3741 = sst [smem:[#allocation32_spill]] %s3262_s17 }
  0x1f   :  { %s3277_s4 = sld [smem:[%s3721_s0 + %s3138_s28]]   ;;  %s3142_s28 = smov 25  }
  0x20   :  { %3742 = sst [smem:[#allocation33_spill]] %s3267_s6 }
  0x21   :  { %s3282_s17 = sld [smem:[%s3721_s0 + %s3139_s7]]   ;;  %s3143_s7 = smov 26  }
  0x22   :  { %s3287_s6 = sld [smem:[%s3721_s0 + %s3140_s15]]   ;;  %s3144_s15 = smov 27  }
  0x23   :  { %s3292_s20 = sld [smem:[%s3721_s0 + %s3141_s22]]   ;;  %s3145_s22 = smov 28  }
  0x24   :  { %s3302_s9 = sld [smem:[%s3721_s0 + %s3143_s7]]   ;;  %s3147_s7 = smov 30  }
  0x25   :  { %3743 = sst [smem:[#allocation34_spill]] %s3277_s4 }
  0x26   :  { %s3297_s4 = sld [smem:[%s3721_s0 + %s3142_s28]]   ;;  %s3146_s28 = smov 29  }
  0x28   :  { %3744 = sst [smem:[#allocation35_spill]] %s3287_s6 }
  0x29   :  { %3745 = sst [smem:[#allocation36_spill]] %s3292_s20 }
  0x2a   :  { %3747 = sst [smem:[#allocation38_spill]] %s3302_s9 }
  0x2b   :  { %s3307_s6 = sld [smem:[%s3721_s0 + %s3144_s15]]   ;;  %s3148_s15 = smov 31  }
  0x2c   :  { %3746 = sst [smem:[#allocation37_spill]] %s3297_s4 }
  0x2d   :  { %s3312_s20 = sld [smem:[%s3721_s0 + %s3145_s22]]   ;;  %s3149_s22 = smov 32  }
  0x2e   :  { %s3317_s4 = sld [smem:[%s3721_s0 + %s3146_s28]]  }
  0x2f   :  { %s3322_s9 = sld [smem:[%s3721_s0 + %s3147_s7]]  }
  0x31   :  { %3748 = sst [smem:[#allocation39_spill]] %s3307_s6 }
  0x32   :  { %s3327_s6 = sld [smem:[%s3721_s0 + %s3148_s15]]  }
  0x33   :  { %3749 = sst [smem:[#allocation40_spill]] %s3312_s20 }
  0x34   :  { %s3332_s20 = sld [smem:[%s3721_s0 + %s3149_s22]]  }
  0x35   :  { %70 = vsyncpa [#allocation3], 0 }
  0x36   :  { %71 = vsyncpa [#allocation5], 0 }
  0x37   :  { %72 = vsyncpa [#allocation8], 0 }
  0x38   :  { %73 = vsyncpa [#allocation11], 0 }
  0x39   :  { %74 = vsyncpa [#allocation14], 0 }
  0x3a   :  { %75 = vsyncpa [#allocation17], 0  ;;  %s3334_s28 = smov 0  }
  0x3b LB: > { %s3750_s24 = sld [smem:[#allocation27_spill]]  ;;  %s3343_s1 = sadd.s32 4294967295, %s3116_s28   ;;  %s3116_s28 = sphi %s3334_s28, %s81_s28  }
  0x3c   : > { %s3751_s8 = sld [smem:[#allocation26_spill]]  ;;  %p2521_p0 = scmp.ge.s32.totalorder %s3116_s28, 1 }
  0x3d   : > { %3752 = sst [smem:[#allocation41_spill]] %s3116_s28  ;;  %p794_p1 = scmp.lt.s32.totalorder %s3116_s28, 3 }
  0x3e   : > { %p2671_p2 = scmp.eq.s32.totalorder %s3343_s1, 0  ;;  %s3150_s7 = smov [#allocation4]  }
  0x3f   : > { %p3348_p3 = pnand %p2521_p0, %p794_p1  ;;  %s835_s10 = sshll.u32 %s3150_s7, 4  ;;  %s836_s10 = int_to_ptr.vmem [resolvable:$true] %s835_s10 }
  0x40   : > { %s3151_s16 = smov [#allocation7]  }
  0x41   : > { %p2640_p4 = pneg %p3348_p3  ;;  %s861_s11 = sshll.u32 %s3750_s24, 4  ;;  %s3361_s11 = int_to_ptr.hbm [resolvable:$true] %s861_s11 }
  0x42   : > { %s833_s0 = sshll.u32 %s3751_s8, 4  ;;  %s3363_s18 = sshll.u32 %s3151_s16, 4  ;;  %s3340_s0 = int_to_ptr.hbm [resolvable:$true] %s833_s0  ;;  %s864_s18 = int_to_ptr.vmem [resolvable:$true] %s3363_s18 }
  0x43   : > { %p3357_p5 = pnand %p2671_p2, %p2640_p4  ;;  %s2786_s23 = sshra.s32 %s3340_s0, 4  ;;  %s2787_s23 = int_to_ptr.hbm [resolvable:$true] %s2786_s23 }
  0x44   : > { %s2788_s26 = scalar_lea.hbm %s2787_s23, 1  ;;  %s2793_s28 = scalar_lea.hbm %s3751_s8, 1 }
  0x45   : > { %p2789_p6 = scmp.ne.s32.totalorder %s2787_s23, %s2788_s26  ;;  %p3370_p7 = pneg %p3357_p5 }
  0x46   : > { %p2794_p10 = scmp.lt.s32.totalorder %s2787_s23, %s3751_s8  ;;  %p2795_p11 = scmp.lt.s32.totalorder %s2793_s28, %s2788_s26 }
  0x47   : > { %p2791_p8 = pnand %p3370_p7, %p2789_p6 }
  0x48   : > { %p2796_p12 = por %p2795_p11, %p2794_p10 }
  0x49   : > { %p2792_p9 = pneg %p2791_p8 }
  0x4b   : > { %p2797_p13 = pnand %p2796_p12, %p2792_p9 }
  0x4d   : > { %2800 = shalt.err (!%p2797_p13)
}
  0x4e   : > { %2646 = dma.hbm_to_vmem [thread:$0]  (!%p3357_p5), %s3340_s0, 16, %s836_s10, [#allocation5]  }
  0x4f   : > { %s2816_s16 = sshra.s32 %s3361_s11, 4  ;;  %s2823_s23 = scalar_lea.hbm %s3750_s24, 192  ;;  %s2817_s16 = int_to_ptr.hbm [resolvable:$true] %s2816_s16 }
  0x50   : > { %s2818_s22 = scalar_lea.hbm %s2817_s16, 192  ;;  %p2824_p6 = scmp.lt.s32.totalorder %s2817_s16, %s3750_s24 }
  0x51   : > { %p2819_p0 = scmp.ne.s32.totalorder %s2817_s16, %s2818_s22  ;;  %p2825_p8 = scmp.lt.s32.totalorder %s2823_s23, %s2818_s22 }
  0x53   : > { %p2821_p1 = pnand %p2819_p0, %p3370_p7  ;;  %p2826_p9 = por %p2825_p8, %p2824_p6 }
  0x55   : > { %p2822_p4 = pneg %p2821_p1 }
  0x57   : > { %p2827_p10 = pnand %p2826_p9, %p2822_p4 }
  0x59   : > { %2830 = shalt.err (!%p2827_p10)
}
  0x5a   : > { %s3152_s28 = smov 128   ;;  %s3153_s0 = smov 8  }
  0x5b   : > { %2652 = dma.hbm_to_vmem [thread:$0]  (!%p3357_p5), %s3361_s11, 3072, %s864_s18, [#allocation8], %s3152_s28, %s3152_s28, %s3153_s0  }
  0x5c   : > { %s3756_s10 = sshll.u32 %s3272_s27, 4  ;;  %s3154_s22 = smov [#allocation10]   ;;  %s909_s10 = int_to_ptr.hbm [resolvable:$true] %s3756_s10 }
  0x5d   : > { %s910_s26 = sshll.u32 %s3154_s22, 4  ;;  %s958_s16 = sshll.u32 %s3317_s4, 4  ;;  %s911_s26 = int_to_ptr.vmem [resolvable:$true] %s910_s26  ;;  %s3397_s16 = int_to_ptr.hbm [resolvable:$true] %s958_s16 }
  0x5e   : > { %s2846_s23 = sshra.s32 %s909_s10, 4  ;;  %s2853_s24 = scalar_lea.hbm %s3272_s27, 192  ;;  %s2847_s23 = int_to_ptr.hbm [resolvable:$true] %s2846_s23 }
  0x5f   : > { %s2848_s8 = scalar_lea.hbm %s2847_s23, 192  ;;  %p2854_p0 = scmp.lt.s32.totalorder %s2847_s23, %s3272_s27 }
  0x60   : > { %p2849_p11 = scmp.ne.s32.totalorder %s2847_s23, %s2848_s8  ;;  %p2855_p1 = scmp.lt.s32.totalorder %s2853_s24, %s2848_s8 }
  0x62   : > { %p2851_p12 = pnand %p2849_p11, %p3370_p7  ;;  %p2856_p4 = por %p2855_p1, %p2854_p0 }
  0x64   : > { %p2852_p13 = pneg %p2851_p12 }
  0x66   : > { %p2857_p6 = pnand %p2856_p4, %p2852_p13 }
  0x68   : > { %2860 = shalt.err (!%p2857_p6)
}
  0x69   : > { %2658 = dma.hbm_to_vmem [thread:$0]  (!%p3357_p5), %s909_s10, 3072, %s911_s26, [#allocation11], %s3152_s28, %s3152_s28, %s3153_s0  }
  0x6a   : > { %s815_s11 = sshll.u32 %s3197_s25, 4  ;;  %s3155_s18 = smov [#allocation13]   ;;  %s3409_s11 = int_to_ptr.hbm [resolvable:$true] %s815_s11 }
  0x6b   : > { %s960_s22 = sshll.u32 %s3155_s18, 4  ;;  %s2876_s8 = sshra.s32 %s3397_s16, 4  ;;  %s961_s22 = int_to_ptr.vmem [resolvable:$true] %s960_s22  ;;  %s2877_s8 = int_to_ptr.hbm [resolvable:$true] %s2876_s8 }
  0x6c   : > { %s2878_s24 = scalar_lea.hbm %s2877_s8, 1  ;;  %s2883_s23 = scalar_lea.hbm %s3317_s4, 1 }
  0x6d   : > { %p2879_p8 = scmp.ne.s32.totalorder %s2877_s8, %s2878_s24  ;;  %p2884_p11 = scmp.lt.s32.totalorder %s2877_s8, %s3317_s4 }
  0x6e   : > { %p2885_p12 = scmp.lt.s32.totalorder %s2883_s23, %s2878_s24 }
  0x6f   : > { %p2881_p9 = pnand %p2879_p8, %p3370_p7 }
  0x70   : > { %p2886_p13 = por %p2885_p12, %p2884_p11 }
  0x71   : > { %p2882_p10 = pneg %p2881_p9 }
  0x73   : > { %p2887_p0 = pnand %p2886_p13, %p2882_p10 }
  0x75   : > { %2890 = shalt.err (!%p2887_p0)
}
  0x76   : > { %2664 = dma.hbm_to_vmem [thread:$0]  (!%p3357_p5), %s3397_s16, 16, %s961_s22, [#allocation14]  }
  0x77   : > { %s3156_s10 = smov [#allocation2]   ;;  %s844_s18 = sshll.u32 %s3217_s14, 4  ;;  %s3420_s18 = int_to_ptr.hbm [resolvable:$true] %s844_s18 }
  0x78   : > { %s817_s26 = sshll.u32 %s3156_s10, 4  ;;  %s2906_s8 = sshra.s32 %s3409_s11, 4  ;;  %s818_s26 = int_to_ptr.vmem [resolvable:$true] %s817_s26  ;;  %s2907_s8 = int_to_ptr.hbm [resolvable:$true] %s2906_s8 }
  0x79   : > { %s2908_s24 = scalar_lea.hbm %s2907_s8, 1  ;;  %s2913_s23 = scalar_lea.hbm %s3197_s25, 1 }
  0x7a   : > { %p2909_p1 = scmp.ne.s32.totalorder %s2907_s8, %s2908_s24  ;;  %p2914_p8 = scmp.lt.s32.totalorder %s2907_s8, %s3197_s25 }
  0x7b   : > { %p2915_p9 = scmp.lt.s32.totalorder %s2913_s23, %s2908_s24 }
  0x7c   : > { %p2911_p4 = pnand %p2909_p1, %p3370_p7 }
  0x7d   : > { %p2916_p10 = por %p2915_p9, %p2914_p8 }
  0x7e   : > { %p2912_p6 = pneg %p2911_p4 }
  0x80   : > { %p2917_p11 = pnand %p2916_p10, %p2912_p6 }
  0x82   : > { %2920 = shalt.err (!%p2917_p11)
}
  0x83   : > { %2643 = dma.hbm_to_vmem [thread:$0]  (!%p3357_p5), %s3409_s11, 16, %s818_s26, [#allocation3]  }
  0x84   : > { %s882_s16 = sshll.u32 %s3242_s12, 4  ;;  %s3157_s22 = smov [#allocation6]   ;;  %s3431_s16 = int_to_ptr.hbm [resolvable:$true] %s882_s16 }
  0x85   : > { %s846_s10 = sshll.u32 %s3157_s22, 4  ;;  %s2936_s8 = sshra.s32 %s3420_s18, 4  ;;  %s847_s10 = int_to_ptr.vmem [resolvable:$true] %s846_s10  ;;  %s2937_s8 = int_to_ptr.hbm [resolvable:$true] %s2936_s8 }
  0x86   : > { %s2938_s24 = scalar_lea.hbm %s2937_s8, 192  ;;  %s2943_s23 = scalar_lea.hbm %s3217_s14, 192 }
  0x87   : > { %p2939_p12 = scmp.ne.s32.totalorder %s2937_s8, %s2938_s24  ;;  %p2944_p1 = scmp.lt.s32.totalorder %s2937_s8, %s3217_s14 }
  0x88   : > { %p2945_p4 = scmp.lt.s32.totalorder %s2943_s23, %s2938_s24 }
  0x89   : > { %p2941_p13 = pnand %p2939_p12, %p3370_p7 }
  0x8a   : > { %p2946_p6 = por %p2945_p4, %p2944_p1 }
  0x8b   : > { %p2942_p0 = pneg %p2941_p13 }
  0x8d   : > { %p2947_p8 = pnand %p2946_p6, %p2942_p0 }
  0x8f   : > { %2950 = shalt.err (!%p2947_p8)
}
  0x90   : > { %2649 = dma.hbm_to_vmem [thread:$0]  (!%p3357_p5), %s3420_s18, 3072, %s847_s10, [#allocation5], %s3152_s28, %s3152_s28, %s3153_s0  }
  0x91   : > { %s3158_s11 = smov [#allocation9]   ;;  %s925_s22 = sshll.u32 %s3282_s17, 4  ;;  %s3445_s22 = int_to_ptr.hbm [resolvable:$true] %s925_s22 }
  0x92   : > { %s884_s26 = sshll.u32 %s3158_s11, 4  ;;  %s2966_s8 = sshra.s32 %s3431_s16, 4  ;;  %s885_s26 = int_to_ptr.vmem [resolvable:$true] %s884_s26  ;;  %s2967_s8 = int_to_ptr.hbm [resolvable:$true] %s2966_s8 }
  0x93   : > { %s2968_s24 = scalar_lea.hbm %s2967_s8, 1  ;;  %s2973_s23 = scalar_lea.hbm %s3242_s12, 1 }
  0x94   : > { %p2969_p9 = scmp.ne.s32.totalorder %s2967_s8, %s2968_s24  ;;  %p2974_p12 = scmp.lt.s32.totalorder %s2967_s8, %s3242_s12 }
  0x95   : > { %p2975_p13 = scmp.lt.s32.totalorder %s2973_s23, %s2968_s24 }
  0x96   : > { %p2971_p10 = pnand %p2969_p9, %p3370_p7 }
  0x97   : > { %p2976_p0 = por %p2975_p13, %p2974_p12 }
  0x98   : > { %p2972_p11 = pneg %p2971_p10 }
  0x9a   : > { %p2977_p1 = pnand %p2976_p0, %p2972_p11 }
  0x9c   : > { %2980 = shalt.err (!%p2977_p1)
}
  0x9d   : > { %2655 = dma.hbm_to_vmem [thread:$0]  (!%p3357_p5), %s3431_s16, 16, %s885_s26, [#allocation8]  }
  0x9e   : > { %s969_s18 = sshll.u32 %s3322_s9, 4  ;;  %s3159_s10 = smov [#allocation12]   ;;  %s3456_s18 = int_to_ptr.hbm [resolvable:$true] %s969_s18 }
  0x9f   : > { %s927_s11 = sshll.u32 %s3159_s10, 4  ;;  %s2996_s8 = sshra.s32 %s3445_s22, 4  ;;  %s928_s11 = int_to_ptr.vmem [resolvable:$true] %s927_s11  ;;  %s2997_s8 = int_to_ptr.hbm [resolvable:$true] %s2996_s8 }
  0xa0   : > { %s2998_s24 = scalar_lea.hbm %s2997_s8, 192  ;;  %s3003_s23 = scalar_lea.hbm %s3282_s17, 192 }
  0xa1   : > { %p2999_p4 = scmp.ne.s32.totalorder %s2997_s8, %s2998_s24  ;;  %p3004_p9 = scmp.lt.s32.totalorder %s2997_s8, %s3282_s17 }
  0xa2   : > { %p3005_p10 = scmp.lt.s32.totalorder %s3003_s23, %s2998_s24 }
  0xa3   : > { %p3001_p6 = pnand %p2999_p4, %p3370_p7 }
  0xa4   : > { %p3006_p11 = por %p3005_p10, %p3004_p9 }
  0xa5   : > { %p3002_p8 = pneg %p3001_p6 }
  0xa7   : > { %p3007_p12 = pnand %p3006_p11, %p3002_p8 }
  0xa9   : > { %3010 = shalt.err (!%p3007_p12)
}
  0xaa   : > { %2661 = dma.hbm_to_vmem [thread:$0]  (!%p3357_p5), %s3445_s22, 3072, %s928_s11, [#allocation11], %s3152_s28, %s3152_s28, %s3153_s0  }
  0xab   : > { %s3160_s16 = smov [#allocation15]   ;;  %s984_s10 = sshll.u32 %s3327_s6, 4  ;;  %s985_s10 = int_to_ptr.hbm [resolvable:$true] %s984_s10 }
  0xac   : > { %s971_s26 = sshll.u32 %s3160_s16, 4  ;;  %s3026_s8 = sshra.s32 %s3456_s18, 4  ;;  %s972_s26 = int_to_ptr.vmem [resolvable:$true] %s971_s26  ;;  %s3027_s8 = int_to_ptr.hbm [resolvable:$true] %s3026_s8 }
  0xad   : > { %s3028_s24 = scalar_lea.hbm %s3027_s8, 32  ;;  %s3033_s23 = scalar_lea.hbm %s3322_s9, 32 }
  0xae   : > { %p3029_p13 = scmp.ne.s32.totalorder %s3027_s8, %s3028_s24  ;;  %p3034_p4 = scmp.lt.s32.totalorder %s3027_s8, %s3322_s9 }
  0xaf   : > { %p3035_p6 = scmp.lt.s32.totalorder %s3033_s23, %s3028_s24 }
  0xb0   : > { %p3031_p0 = pnand %p3029_p13, %p3370_p7 }
  0xb1   : > { %p3036_p8 = por %p3035_p6, %p3034_p4 }
  0xb2   : > { %p3032_p1 = pneg %p3031_p0 }
  0xb4   : > { %p3037_p9 = pnand %p3036_p8, %p3032_p1 }
  0xb6   : > { %3040 = shalt.err (!%p3037_p9)
}
  0xb7   : > { %2667 = dma.hbm_to_vmem [thread:$0]  (!%p3357_p5), %s3456_s18, 512, %s972_s26, [#allocation14], %s3152_s28, %s3152_s28, %s3153_s0  }
  0xb8   : > { %s3161_s22 = smov [#allocation16]   ;;  %s3056_s16 = sshra.s32 %s985_s10, 4  ;;  %s3057_s16 = int_to_ptr.hbm [resolvable:$true] %s3056_s16 }
  0xb9   : > { %s986_s11 = sshll.u32 %s3161_s22, 4  ;;  %s3058_s8 = scalar_lea.hbm %s3057_s16, 1  ;;  %s987_s11 = int_to_ptr.vmem [resolvable:$true] %s986_s11 }
  0xba   : > { %p3059_p10 = scmp.ne.s32.totalorder %s3057_s16, %s3058_s8  ;;  %s3063_s24 = scalar_lea.hbm %s3327_s6, 1 }
  0xbb   : > { %p3064_p13 = scmp.lt.s32.totalorder %s3057_s16, %s3327_s6  ;;  %p3065_p0 = scmp.lt.s32.totalorder %s3063_s24, %s3058_s8 }
  0xbc   : > { %p3061_p11 = pnand %p3059_p10, %p3370_p7 }
  0xbd   : > { %p3066_p1 = por %p3065_p0, %p3064_p13 }
  0xbe   : > { %p3062_p12 = pneg %p3061_p11 }
  0xc0   : > { %p3067_p4 = pnand %p3066_p1, %p3062_p12 }
  0xc2   : > { %3070 = shalt.err (!%p3067_p4)
}
  0xc3   : > { %2670 = dma.hbm_to_vmem [thread:$0]  (!%p3357_p5), %s985_s10, 16, %s987_s11, [#allocation17]  }
  0xc4   : > { %1013 = sbr.rel (%p3348_p3) target bundleno = 4085 (0xff5), region = 148 }
  0xc9   : > { %3091 = dma.done.wait (%p2671_p2), [#allocation3], 16  }
  0xca   : > { %3093 = vsyncadd (%p2671_p2), [#allocation3], 4294967280 }
  0xcb   : > { %3095 = dma.done.wait (%p2671_p2), [#allocation5], 3088  }
  0xcc   : > { %3097 = vsyncadd (%p2671_p2), [#allocation5], 4294964208 }
  0xcd   : > { %3099 = dma.done.wait (%p2671_p2), [#allocation8], 3088  }
  0xce   : > { %3101 = vsyncadd (%p2671_p2), [#allocation8], 4294964208 }
  0xcf   : > { %3103 = dma.done.wait (%p2671_p2), [#allocation11], 6144  }
  0xd0   : > { %3105 = vsyncadd (%p2671_p2), [#allocation11], 4294961152 }
  0xd1   : > { %3107 = dma.done.wait (%p2671_p2), [#allocation14], 528  }
  0xd2   : > { %3109 = vsyncadd (%p2671_p2), [#allocation14], 4294966768 }
  0xd3   : > { %3111 = dma.done.wait (%p2671_p2), [#allocation17], 16  }
  0xd4   : > { %3113 = vsyncadd (%p2671_p2), [#allocation17], 4294967280  ;;  %p1143_p3 = scmp.lt.s32.totalorder %s3343_s1, 1  ;;  %vm1165_vm0 = vcmask 1043456   ;;  %vm1161_vm1 = vcmask 31744   ;;  %v1194_v2 = vld [vmem:[%s3207_s3 + $0x18] sm:$0xff] }
  0xd5   : > { %v1156_v0 = vld [vmem:[%s3192_s21] sm:$0xf]  ;;  %1215 = vmatpush.msra.mxu1 %v1194_v2  ;;  %v1193_v3 = vld [vmem:[%s3207_s3 + $0x10] sm:$0xff]  ;;  %v1192_v4 = vld [vmem:[%s3207_s3 + $0x8] sm:$0xff]  ;;  %vm1199_vm2 = vcmask 261120   ;;  %vm1224_vm3 = vcmask 64512  }
  0xd6   : > { %s3774_s1 = smov (!%p1143_p3, %s3343_s1), 1  ;;  %2547 = vmatpush.msk.msra.mxu0 %vm1165_vm0, %v1156_v0  ;;  %v1191_v5 = vld [vmem:[%s3207_s3] sm:$0xff]  ;;  %v3534_v14 = vld [vmem:[%s3182_s13 + $0x8] sm:$0xff]  ;;  %v3537_v15 = vld [vmem:[%s3182_s13 + $0x10] sm:$0xff]  ;;  %s3163_s7 = smov 64   ;;  %vm1307_vm4 = vcmask 523264  }
  0xd7   : > { %s3515_s2 = sshll.u32 %s3774_s1, 3  ;;  %1216 = vmatpush.msra.mxu1 %v1193_v3  ;;  %v2745_v6 = vld [vmem:[#allocation2] ss:$0 sm:$0xff]  ;;  %v2746_v11 = vld [vmem:[#allocation4] ss:$0 sm:$0xff]  ;;  %v1319_v19 = vld [vmem:[#allocation6 + $0x50] sm:$0xff] }
  0xd8   : > { %s1146_s15 = scalar_lea.vmem %s3172_s5, %s3515_s2  ;;  %v1189_v8 = vld [vmem:[%s3202_s29] sm:$0xff]  ;;  %v1359_v20 = vld [vmem:[#allocation7 + $0x50] sm:$0xff]  ;;  %v1318_v21 = vld [vmem:[#allocation6 + $0x48] sm:$0xff]  ;;  %s3162_s1 = smov 32   ;;  %vm1325_vm5 = vcmask 785408  }
  0xd9   : > { %v1155_v1 = vld [vmem:[%s1146_s15] sm:$0xff]  ;;  %1217 = vmatpush.msra.mxu1 %v1192_v4  ;;  %v1358_v22 = vld [vmem:[#allocation7 + $0x48] sm:$0xff]  ;;  %v1315_v27 = vld [vmem:[#allocation6 + $0x30] sm:$0xff]  ;;  %s3757_s28 = sld [smem:[#allocation24_spill]] }
  0xda   : > { %2548 = vmatmul.msk.f32.vlgmr.msra.gmra.mxu0 %vm1161_vm1, %v1155_v1  ;;  %v3540_v16 = vld [vmem:[%s3182_s13] sm:$0xff]  ;;  %v1355_v28 = vld [vmem:[#allocation7 + $0x30] sm:$0xff]  ;;  %v1314_v29 = vld [vmem:[#allocation6 + $0x28] sm:$0xff]  ;;  %s3758_s0 = sld [smem:[#allocation29_spill]] }
  0xdb   : > { %1218 = vmatpush.msra.mxu1 %v1191_v5  ;;  %v1320_v17 = vld [vmem:[#allocation6 + $0x58] sm:$0xff]  ;;  %v1317_v23 = vld [vmem:[#allocation6 + $0x40] sm:$0xff]  ;;  %v1354_v30 = vld [vmem:[#allocation7 + $0x28] sm:$0xff]  ;;  %s3759_s26 = sld [smem:[#allocation28_spill]] }
  0xdc   : > { %v1360_v18 = vld [vmem:[#allocation7 + $0x58] sm:$0xff]  ;;  %v1357_v24 = vld [vmem:[#allocation7 + $0x40] sm:$0xff]  ;;  %v1311_v37 = vld [vmem:[#allocation6 + $0x10] sm:$0xff]  ;;  %s3760_s10 = sld [smem:[#allocation32_spill]] }
  0xdd   : > { %v1316_v25 = vld [vmem:[#allocation6 + $0x38] sm:$0xff]  ;;  %v1313_v33 = vld [vmem:[#allocation6 + $0x20] sm:$0xff]  ;;  %v1351_v38 = vld [vmem:[#allocation7 + $0x10] sm:$0xff]  ;;  %s3761_s23 = sld [smem:[#allocation30_spill]] }
  0xde   : > { %v1356_v26 = vld [vmem:[#allocation7 + $0x38] sm:$0xff]  ;;  %v1353_v34 = vld [vmem:[#allocation7 + $0x20] sm:$0xff]  ;;  %v1310_v39 = vld [vmem:[#allocation6 + $0x8] sm:$0xff]  ;;  %s3762_s22 = sld [smem:[#allocation31_spill]] }
  0xdf   : > { %v1312_v35 = vld [vmem:[#allocation6 + $0x18] sm:$0xff]  ;;  %v1350_v40 = vld [vmem:[#allocation7 + $0x8] sm:$0xff]  ;;  %v1309_v41 = vld [vmem:[#allocation6] sm:$0xff]  ;;  %s1150_s18 = scalar_lea.vmem %s3757_s28, %s3515_s2  ;;  %s3763_s11 = sld [smem:[#allocation33_spill]] }
  0xe0   : > { %v1352_v36 = vld [vmem:[#allocation7 + $0x18] sm:$0xff]  ;;  %v1349_v42 = vld [vmem:[#allocation7] sm:$0xff]  ;;  %s3764_s16 = sld [smem:[#allocation25_spill]] }
  0xe1   : > { %v2748_v48 = vld [vmem:[%s3232_s30] ss:$0 sm:$0xff]  ;;  %s3765_s8 = sld [smem:[#allocation36_spill]] }
  0xe2   : > { %v2747_v58 = vld [vmem:[%s3222_s19] ss:$0 sm:$0xff]  ;;  %s3766_s24 = sld [smem:[#allocation35_spill]] }
  0xe3   : > { %s3767_s15 = sld [smem:[#allocation34_spill]] }
  0xe4   : > { %s3768_s28 = sld [smem:[#allocation37_spill]] }
 0x157   : > { %v1186_v7 = vpop.f32.mrf.mxu0 }
 0x158   : > { %v1187_v9 = vadd.f32 %v2745_v6, %v1186_v7  ;;  %v1489_v6 = vld [vmem:[#allocation6 + $0xb8] sm:$0xff] }
 0x159   : > { %v1530_v7 = vld [vmem:[#allocation7 + $0xb8] sm:$0xff] }
 0x15a   : > { %v3527_v10 = vadd.f32 %v1189_v8, %v1187_v9  ;;  %v1488_v8 = vld [vmem:[#allocation6 + $0xb0] sm:$0xff] }
 0x15b   : > { %v1529_v9 = vld [vmem:[#allocation7 + $0xb0] sm:$0xff] }
 0x15c   : > { %2549 = vmatmul.msk.f32.vlgmr.msra.gmra.mxu1 %vm1199_vm2, %v3527_v10 }
 0x1d9   : > { %v1220_v12 = vpop.f32.mrf.mxu1 }
 0x1da   : > { %v3531_v13 = vadd.f32 %v2746_v11, %v1220_v12  ;;  %v1487_v11 = vld [vmem:[#allocation6 + $0xa8] sm:$0xff] }
 0x1db   : > { %v1528_v12 = vld [vmem:[#allocation7 + $0xa8] sm:$0xff] }
 0x1dc   : > { %1243 = vmatpush.msra.mxu2 %v3531_v13  ;;  %1268 = vmatpush.msra.mxu3 %v3531_v13 }
 0x1dd   : > { %1293 = vmatpush.msrb.mxu0 %v3531_v13  ;;  %2552 = vmatmul.msk.f32.vlgmr.msra.gmra.mxu3 %vm1224_vm3, %v3534_v14 }
 0x1de   : > { %2554 = vmatmul.msk.f32.vlgmr.msrb.gmra.mxu0 %vm1224_vm3, %v3537_v15  ;;  %2550 = vmatmul.msk.f32.vlgmr.msra.gmra.mxu2 %vm1224_vm3, %v3540_v16 }
 0x1df   : > { %1333 = vmatpush.msrb.mxu2 %v1320_v17  ;;  %1369 = vmatpush.msrb.mxu3 %v1360_v18  ;;  %v1526_v17 = vld [vmem:[#allocation7 + $0x98] sm:$0xff]  ;;  %v1484_v18 = vld [vmem:[#allocation6 + $0x90] sm:$0xff] }
 0x1e1   : > { %1334 = vmatpush.msrb.mxu2 %v1319_v19  ;;  %1370 = vmatpush.msrb.mxu3 %v1359_v20  ;;  %v1483_v19 = vld [vmem:[#allocation6 + $0x88] sm:$0xff] }
 0x1e2   : > { %v1524_v20 = vld [vmem:[#allocation7 + $0x88] sm:$0xff] }
 0x1e3   : > { %1335 = vmatpush.msrb.mxu2 %v1318_v21  ;;  %1371 = vmatpush.msrb.mxu3 %v1358_v22 }
 0x1e5   : > { %1336 = vmatpush.msrb.mxu2 %v1317_v23  ;;  %1372 = vmatpush.msrb.mxu3 %v1357_v24  ;;  %v1482_v24 = vld [vmem:[#allocation6 + $0x80] sm:$0xff] }
 0x1e7   : > { %1337 = vmatpush.msrb.mxu2 %v1316_v25  ;;  %1373 = vmatpush.msrb.mxu3 %v1356_v26  ;;  %v1523_v25 = vld [vmem:[#allocation7 + $0x80] sm:$0xff]  ;;  %v1481_v26 = vld [vmem:[#allocation6 + $0x78] sm:$0xff] }
 0x1e9   : > { %1338 = vmatpush.msrb.mxu2 %v1315_v27  ;;  %1374 = vmatpush.msrb.mxu3 %v1355_v28  ;;  %v1522_v27 = vld [vmem:[#allocation7 + $0x78] sm:$0xff]  ;;  %v1480_v28 = vld [vmem:[#allocation6 + $0x70] sm:$0xff] }
 0x1eb   : > { %1339 = vmatpush.msrb.mxu2 %v1314_v29  ;;  %1375 = vmatpush.msrb.mxu3 %v1354_v30  ;;  %v1521_v29 = vld [vmem:[#allocation7 + $0x70] sm:$0xff]  ;;  %v1479_v30 = vld [vmem:[#allocation6 + $0x68] sm:$0xff] }
 0x1ed   : > { %1340 = vmatpush.msrb.mxu2 %v1313_v33  ;;  %1376 = vmatpush.msrb.mxu3 %v1353_v34  ;;  %v1519_v33 = vld [vmem:[#allocation7 + $0x60] sm:$0xff]  ;;  %v1612_v34 = vld [vmem:[%s3758_s0] sm:$0xf]  ;;  %s3769_s0 = sld [smem:[#allocation38_spill]] }
 0x1ef   : > { %1341 = vmatpush.msrb.mxu2 %v1312_v35  ;;  %1377 = vmatpush.msrb.mxu3 %v1352_v36  ;;  %v1611_v35 = vld [vmem:[%s1150_s18] sm:$0xff]  ;;  %s3770_s18 = sld [smem:[#allocation39_spill]] }
 0x1f1   : > { %1342 = vmatpush.msrb.mxu2 %v1311_v37  ;;  %1378 = vmatpush.msrb.mxu3 %v1351_v38 }
 0x1f3   : > { %1343 = vmatpush.msrb.mxu2 %v1310_v39  ;;  %1379 = vmatpush.msrb.mxu3 %v1350_v40  ;;  %v1581_v40 = vld [vmem:[%s3759_s26 + $0x18] sm:$0xff] }
 0x1f5   : > { %1344 = vmatpush.msrb.mxu2 %v1309_v41  ;;  %1380 = vmatpush.msrb.mxu3 %v1349_v42  ;;  %v1580_v41 = vld [vmem:[%s3759_s26 + $0x10] sm:$0xff]  ;;  %v2750_v42 = vld [vmem:[%s3232_s30 + $0x1] ss:$0 sm:$0xff] }
 0x1f7   : > { %2567 = vmatpush.msk.msra.mxu3 %vm1165_vm0, %v1612_v34  ;;  %1601 = vmatpush.msra.mxu2 %v1581_v40  ;;  %v1767_v34 = vld [vmem:[#allocation10 + $0x38] sm:$0xff] }
 0x1f9   : > { %1602 = vmatpush.msra.mxu2 %v1580_v41 }
 0x25b   : > { %v1295_v32 = vpop.f32.mrf.mxu0 }
 0x260   : > { %v1270_v31 = vpop.f32.mrf.mxu3 }
 0x261   : > { %1299 = vrot.lane.b32.xlu0 %v1270_v31, %s3162_s1  ;;  %v1245_v44 = vpop.f32.mrf.mxu2  ;;  %v1520_v31 = vld [vmem:[#allocation7 + $0x68] sm:$0xff] }
 0x269   : > { %1303 = vrot.lane.b32.xlu0 %v1295_v32, %s3163_s7  ;;  %v1478_v32 = vld [vmem:[#allocation6 + $0x60] sm:$0xff] }
 0x2d3   : > { %v1300_v43 = vpop.permute.xlu0 %1299 }
 0x2d4   : > { %v1306_v45 = vsel %vm1199_vm2, %v1245_v44, %v1300_v43  ;;  %v1579_v43 = vld [vmem:[%s3759_s26 + $0x8] sm:$0xff]  ;;  %v1578_v44 = vld [vmem:[%s3759_s26] sm:$0xff] }
 0x2d5   : > { %1603 = vmatpush.msra.mxu2 %v1579_v43  ;;  %v1803_v43 = vld [vmem:[#allocation12 + $0x20] sm:$0xff] }
 0x2d7   : > { %1604 = vmatpush.msra.mxu2 %v1578_v44  ;;  %v1763_v44 = vld [vmem:[#allocation10 + $0x18] sm:$0xff] }
 0x2db   : > { %v1304_v46 = vpop.permute.xlu0 %1303 }
 0x2dc   : > { %v1308_v47 = vsel %vm1307_vm4, %v1306_v45, %v1304_v46 }
 0x2dd   : > { %2555 = vmatmul.msk.f32.vlgmr.msrb.gmra.mxu2 %vm1325_vm5, %v1308_v47  ;;  %2556 = vmatmul.msk.f32.vlgmr.msrb.gmra.mxu3 %vm1325_vm5, %v1308_v47 }
 0x2e5   : > { %2568 = vmatmul.msk.f32.vlgmr.msra.gmra.mxu3 %vm1161_vm1, %v1611_v35  ;;  %v1806_v35 = vld [vmem:[#allocation12 + $0x38] sm:$0xff] }
 0x360   : > { %v1382_v49 = vpop.f32.mrf.mxu3  ;;  %v1346_v61 = vpop.f32.mrf.mxu2 }
 0x361   : > { %v1383_v50 = vadd.f32 %v2748_v48, %v1382_v49  ;;  %v1347_v0 = vadd.f32 %v2747_v58, %v1346_v61  ;;  %v1648_v48 = vld [vmem:[%s3760_s10 + $0x18] sm:$0xff]  ;;  %v1647_v49 = vld [vmem:[%s3760_s10 + $0x10] sm:$0xff]  ;;  %v2749_v58 = vld [vmem:[%s3222_s19 + $0x1] ss:$0 sm:$0xff] }
 0x362   : > { %1668 = vmatpush.msrb.mxu2 %v1648_v48  ;;  %v1761_v48 = vld [vmem:[#allocation10 + $0x8] sm:$0xff] }
 0x363   : > { %v2557_v51 = vmul.f32 -1.442695, %v1383_v50  ;;  %v1646_v50 = vld [vmem:[%s3760_s10 + $0x8] sm:$0xff] }
 0x364   : > { %1669 = vmatpush.msrb.mxu2 %v1647_v49  ;;  %v1800_v49 = vld [vmem:[#allocation12 + $0x8] sm:$0xff] }
 0x365   : > { %2762 = vpow2.f32 %v2557_v51  ;;  %v1645_v51 = vld [vmem:[%s3760_s10] sm:$0xff] }
 0x366   : > { %1670 = vmatpush.msrb.mxu2 %v1646_v50  ;;  %v1760_v50 = vld [vmem:[#allocation10] sm:$0xff] }
 0x368   : > { %1671 = vmatpush.msrb.mxu2 %v1645_v51  ;;  %v1799_v51 = vld [vmem:[#allocation12] sm:$0xff] }
 0x36b   : > { %v2763_v52 = vpop.eup %2762 }
 0x36c   : > { %v1388_v53 = vadd.f32 1.0, %v2763_v52 }
 0x36e   : > { %2764 = vrcp.f32 %v1388_v53  ;;  %v1400_v57 = vand.u32 2147483648, %v1388_v53  ;;  %v1398_v60 = vand.u32 2147483647, %v1388_v53  ;;  %vm1394_vm7 = vweird.f32 %v1388_v53 }
 0x370   : > { %v1401_v63 = vor.u32 1.1754944e-38, %v1400_v57  ;;  %vm1399_vm9 = vcmp.eq.f32.partialorder %v1398_v60, 8.507059e+37 }
 0x374   : > { %v2765_v54 = vpop.eup %2764 }
 0x375   : > { %v1390_v55 = vmul.f32 %v2765_v54, %v1388_v53  ;;  %vm1395_vm6 = vweird.f32 %v2765_v54 }
 0x376   : > { %vm1396_vm8 = vmor %vm1394_vm7, %vm1395_vm6 }
 0x377   : > { %v1391_v56 = vsub.f32 1.0, %v1390_v55 }
 0x379   : > { %v1392_v59 = vmul.f32 %v2765_v54, %v1391_v56 }
 0x37b   : > { %v1393_v62 = vadd.f32 %v2765_v54, %v1392_v59 }
 0x37d   : > { %v1397_v1 = vsel %vm1396_vm8, %v2765_v54, %v1393_v62 }
 0x37e   : > { %v1402_v2 = vsel %vm1399_vm9, %v1401_v63, %v1397_v1 }
 0x37f   : > { %v1404_v3 = vmul.f32 %v1402_v2, %v1347_v0 }
 0x381   : > { %v1405_v4 = vadd.f32 %v1404_v3, %v3531_v13  ;;  %v1486_v13 = vld [vmem:[#allocation6 + $0xa0] sm:$0xff] }
 0x383   : > { %v3560_v5 = vmul.f32 0.70710677, %v1405_v4 }
 0x385   : > { %1422 = vmatpush.msrb.mxu1 %v3560_v5  ;;  %1442 = vmatpush.msra.mxu0 %v3560_v5 }
 0x386   : > { %2558 = vmatmul.msk.f32.vlgmr.msrb.gmra.mxu1 %vm1224_vm3, %v3540_v16  ;;  %2559 = vmatmul.msk.f32.vlgmr.msra.gmra.mxu0 %vm1224_vm3, %v3534_v14  ;;  %v1527_v16 = vld [vmem:[#allocation7 + $0xa0] sm:$0xff]  ;;  %v1485_v14 = vld [vmem:[#allocation6 + $0x98] sm:$0xff] }
 0x387   : > { %1462 = vmatpush.msra.mxu1 %v3560_v5  ;;  %1502 = vmatpush.msrb.mxu0 %v1489_v6  ;;  %v2751_v6 = vld [vmem:[%s3761_s23] ss:$0 sm:$0xff] }
 0x389   : > { %1540 = vmatpush.msrb.mxu1 %v1530_v7  ;;  %1503 = vmatpush.msrb.mxu0 %v1488_v8  ;;  %v1640_v7 = vpop.f32.mrf.mxu3 }
 0x38b   : > { %1541 = vmatpush.msrb.mxu1 %v1529_v9  ;;  %1504 = vmatpush.msrb.mxu0 %v1487_v11  ;;  %v1641_v9 = vadd.f32 %v2751_v6, %v1640_v7  ;;  %v1643_v11 = vld [vmem:[%s3762_s22] sm:$0xff] }
 0x38d   : > { %1542 = vmatpush.msrb.mxu1 %v1528_v12  ;;  %1505 = vmatpush.msrb.mxu0 %v1486_v13  ;;  %v3596_v12 = vadd.f32 %v1643_v11, %v1641_v9 }
 0x38e   : > { %2560 = vmatmul.msk.f32.vlgmr.msra.gmra.mxu1 %vm1224_vm3, %v3537_v15  ;;  %v1525_v15 = vld [vmem:[#allocation7 + $0x90] sm:$0xff] }
 0x38f   : > { %1543 = vmatpush.msrb.mxu1 %v1527_v16  ;;  %1506 = vmatpush.msrb.mxu0 %v1485_v14  ;;  %v2753_v16 = vld [vmem:[%s3763_s11] ss:$0 sm:$0xff]  ;;  %v2752_v14 = vld [vmem:[#allocation9] ss:$0 sm:$0xff] }
 0x391   : > { %1544 = vmatpush.msrb.mxu1 %v1526_v17  ;;  %1507 = vmatpush.msrb.mxu0 %v1484_v18  ;;  %v3604_v18 = vld [vmem:[%s3764_s16 + $0x8] sm:$0xff] }
 0x393   : > { %1545 = vmatpush.msrb.mxu1 %v1525_v15  ;;  %1508 = vmatpush.msrb.mxu0 %v1483_v19  ;;  %v3609_v19 = vld [vmem:[%s3765_s8 + $0x18] sm:$0xff] }
 0x395   : > { %1546 = vmatpush.msrb.mxu1 %v1524_v20  ;;  %1509 = vmatpush.msrb.mxu0 %v1482_v24  ;;  %v3614_v20 = vld [vmem:[%s3764_s16 + $0x10] sm:$0xff]  ;;  %v3633_v24 = vld [vmem:[%s3765_s8 + $0x8] sm:$0xff] }
 0x397   : > { %1547 = vmatpush.msrb.mxu1 %v1523_v25  ;;  %1510 = vmatpush.msrb.mxu0 %v1481_v26  ;;  %v3639_v25 = vld [vmem:[%s3765_s8] sm:$0xff] }
 0x399   : > { %1548 = vmatpush.msrb.mxu1 %v1522_v27  ;;  %1511 = vmatpush.msrb.mxu0 %v1480_v28  ;;  %v1810_v27 = vld [vmem:[#allocation12 + $0x58] sm:$0xff]  ;;  %v1770_v28 = vld [vmem:[#allocation10 + $0x50] sm:$0xff] }
 0x39b   : > { %1549 = vmatpush.msrb.mxu1 %v1521_v29  ;;  %1512 = vmatpush.msrb.mxu0 %v1479_v30  ;;  %v1809_v29 = vld [vmem:[#allocation12 + $0x50] sm:$0xff]  ;;  %v1769_v30 = vld [vmem:[#allocation10 + $0x48] sm:$0xff] }
 0x39d   : > { %1550 = vmatpush.msrb.mxu1 %v1520_v31  ;;  %1513 = vmatpush.msrb.mxu0 %v1478_v32  ;;  %v1808_v31 = vld [vmem:[#allocation12 + $0x48] sm:$0xff]  ;;  %v1768_v32 = vld [vmem:[#allocation10 + $0x40] sm:$0xff] }
 0x39f   : > { %1551 = vmatpush.msrb.mxu1 %v1519_v33  ;;  %v1807_v33 = vld [vmem:[#allocation12 + $0x40] sm:$0xff] }
 0x3a1   : > { %1819 = vmatpush.msra.mxu1 %v1810_v27 }
 0x3a3   : > { %1820 = vmatpush.msra.mxu1 %v1809_v29 }
 0x3a5   : > { %1821 = vmatpush.msra.mxu1 %v1808_v31 }
 0x3a7   : > { %1822 = vmatpush.msra.mxu1 %v1807_v33 }
 0x3a9   : > { %1823 = vmatpush.msra.mxu1 %v1806_v35 }
 0x403   : > { %v1424_v21 = vpop.f32.mrf.mxu1  ;;  %v1444_v22 = vpop.f32.mrf.mxu0 }
 0x404   : > { %1468 = vrot.lane.b32.xlu1 %v1444_v22, %s3162_s1  ;;  %v3623_v22 = vld [vmem:[%s3765_s8 + $0x10] sm:$0xff] }
 0x40b   : > { %v1464_v23 = vpop.f32.mrf.mxu1 }
 0x40c   : > { %1472 = vrot.lane.b32.xlu1 %v1464_v23, %s3163_s7 }
 0x476   : > { %v1469_v36 = vpop.permute.xlu1 %1468 }
 0x477   : > { %v1475_v37 = vsel %vm1199_vm2, %v1424_v21, %v1469_v36  ;;  %v3617_v21 = vld [vmem:[%s3764_s16] sm:$0xff]  ;;  %v1766_v36 = vld [vmem:[#allocation10 + $0x30] sm:$0xff] }
 0x47e   : > { %v1473_v38 = vpop.permute.xlu1 %1472 }
 0x47f   : > { %v1476_v39 = vsel %vm1307_vm4, %v1475_v37, %v1473_v38  ;;  %v1805_v37 = vld [vmem:[#allocation12 + $0x30] sm:$0xff]  ;;  %v1765_v38 = vld [vmem:[#allocation10 + $0x28] sm:$0xff] }
 0x480   : > { %2562 = vmatmul.msk.f32.vlgmr.msrb.gmra.mxu0 %vm1325_vm5, %v1476_v39  ;;  %2564 = vmatmul.msk.f32.vlgmr.msrb.gmra.mxu1 %vm1325_vm5, %v1476_v39  ;;  %v1804_v39 = vld [vmem:[#allocation12 + $0x28] sm:$0xff] }
 0x481   : > { %1824 = vmatpush.msra.mxu1 %v1805_v37  ;;  %v1950_v37 = vld [vmem:[%s3769_s0 + $0x10] sm:$0xff] }
 0x483   : > { %1825 = vmatpush.msra.mxu1 %v1804_v39 }
 0x485   : > { %1826 = vmatpush.msra.mxu1 %v1803_v43 }
 0x4fd   : > { %v1553_v45 = vpop.f32.mrf.mxu1  ;;  %v1515_v61 = vpop.f32.mrf.mxu0 }
 0x4fe   : > { %v1554_v46 = vadd.f32 %v2750_v42, %v1553_v45  ;;  %v1516_v0 = vadd.f32 %v2749_v58, %v1515_v61  ;;  %v1764_v42 = vld [vmem:[#allocation10 + $0x20] sm:$0xff]  ;;  %v1802_v45 = vld [vmem:[#allocation12 + $0x18] sm:$0xff] }
 0x4ff   : > { %1827 = vmatpush.msra.mxu1 %v1802_v45 }
 0x500   : > { %v2565_v47 = vmul.f32 -1.442695, %v1554_v46  ;;  %v1762_v46 = vld [vmem:[#allocation10 + $0x10] sm:$0xff] }
 0x502   : > { %2766 = vpow2.f32 %v2565_v47  ;;  %v1801_v47 = vld [vmem:[#allocation12 + $0x10] sm:$0xff] }
 0x503   : > { %1828 = vmatpush.msra.mxu1 %v1801_v47 }
 0x505   : > { %1829 = vmatpush.msra.mxu1 %v1800_v49 }
 0x507   : > { %1830 = vmatpush.msra.mxu1 %v1799_v51  ;;  %v2103_v51 = vld [vmem:[#allocation12 + $0xa0] sm:$0xff] }
 0x508   : > { %v2767_v52 = vpop.eup %2766 }
 0x509   : > { %v1559_v53 = vadd.f32 1.0, %v2767_v52 }
 0x50b   : > { %2768 = vrcp.f32 %v1559_v53  ;;  %v1571_v57 = vand.u32 2147483648, %v1559_v53  ;;  %v1569_v60 = vand.u32 2147483647, %v1559_v53  ;;  %vm1565_vm11 = vweird.f32 %v1559_v53 }
 0x50d   : > { %v1572_v63 = vor.u32 1.1754944e-38, %v1571_v57  ;;  %vm1570_vm13 = vcmp.eq.f32.partialorder %v1569_v60, 8.507059e+37  ;;  %v2754_v57 = vld [vmem:[%s3766_s24] ss:$0 sm:$0xff] }
 0x511   : > { %v2769_v54 = vpop.eup %2768 }
 0x512   : > { %v1561_v55 = vmul.f32 %v2769_v54, %v1559_v53  ;;  %vm1566_vm10 = vweird.f32 %v2769_v54 }
 0x513   : > { %vm1567_vm12 = vmor %vm1565_vm11, %vm1566_vm10 }
 0x514   : > { %v1562_v56 = vsub.f32 1.0, %v1561_v55 }
 0x516   : > { %v1563_v59 = vmul.f32 %v2769_v54, %v1562_v56 }
 0x518   : > { %v1564_v62 = vadd.f32 %v2769_v54, %v1563_v59 }
 0x51a   : > { %v1568_v1 = vsel %vm1567_vm12, %v2769_v54, %v1564_v62 }
 0x51b   : > { %v1573_v2 = vsel %vm1570_vm13, %v1572_v63, %v1568_v1 }
 0x51c   : > { %v1575_v3 = vmul.f32 %v1573_v2, %v1516_v0 }
 0x51e   : > { %v1576_v4 = vadd.f32 %v1575_v3, %v3560_v5  ;;  %v2755_v3 = vld [vmem:[%s3767_s15] ss:$0 sm:$0xff] }
 0x520   : > { %v1577_v8 = vmul.f32 0.70710677, %v1576_v4 }
 0x522   : > { %2566 = vmatmul.msk.f32.vlgmr.msra.gmra.mxu2 %vm1199_vm2, %v1577_v8 }
 0x52a   : > { %2569 = vmatmul.msk.f32.vlgmr.msrb.gmra.mxu2 %vm1199_vm2, %v3596_v12 }
 0x5a5   : > { %v1606_v13 = vpop.f32.mrf.mxu2 }
 0x5a6   : > { %v3606_v15 = vadd.f32 %v2752_v14, %v1606_v13 }
 0x5a8   : > { %v1609_v23 = vadd.f32 %v3606_v15, %v3527_v10  ;;  %v1771_v10 = vld [vmem:[#allocation10 + $0x58] sm:$0xff] }
 0x5aa   : > { %v3642_v26 = vmul.f32 0.70710677, %v1609_v23 }
 0x5ad   : > { %v1673_v5 = vpop.f32.mrf.mxu2 }
 0x5ae   : > { %v3601_v17 = vadd.f32 %v2753_v16, %v1673_v5  ;;  %v3656_v5 = vld [vmem:[%s3768_s28] ss:$0 sm:$0xff] }
 0x5b0   : > { %1695 = vmatpush.msrb.mxu3 %v3601_v17  ;;  %1720 = vmatpush.msra.mxu0 %v3601_v17 }
 0x5b1   : > { %1745 = vmatpush.msra.mxu2 %v3601_v17  ;;  %2572 = vmatmul.msk.f32.vlgmr.msra.gmra.mxu0 %vm1224_vm3, %v3604_v18 }
 0x5b2   : > { %1878 = vmatpush.msrb.mxu0 %v3609_v19  ;;  %2574 = vmatmul.msk.f32.vlgmr.msra.gmra.mxu2 %vm1224_vm3, %v3614_v20 }
 0x5b3   : > { %2579 = vmatpush.xpose.msk.msrb.mxu2 %vm1199_vm2, %v3606_v15  ;;  %2570 = vmatmul.msk.f32.vlgmr.msrb.gmra.mxu3 %vm1224_vm3, %v3617_v21 }
 0x5b4   : > { %1879 = vmatpush.msrb.mxu0 %v3623_v22  ;;  %1783 = vmatpush.msra.mxu3 %v1771_v10 }
 0x5b6   : > { %1880 = vmatpush.msrb.mxu0 %v3633_v24  ;;  %1784 = vmatpush.msra.mxu3 %v1770_v28 }
 0x5b8   : > { %1881 = vmatpush.msrb.mxu0 %v3639_v25  ;;  %1785 = vmatpush.msra.mxu3 %v1769_v30 }
 0x5ba   : > { %1943 = vmatpush.msra.mxu0 %v3642_v26  ;;  %1786 = vmatpush.msra.mxu3 %v1768_v32 }
 0x5bc   : > { %1787 = vmatpush.msra.mxu3 %v1767_v34 }
 0x5be   : > { %1788 = vmatpush.msra.mxu3 %v1766_v36  ;;  %v1951_v36 = vld [vmem:[%s3769_s0 + $0x18] sm:$0xff] }
 0x5bf   : > { %1971 = vmatpush.msra.mxu2 %v1951_v36 }
 0x5c0   : > { %1789 = vmatpush.msra.mxu3 %v1765_v38  ;;  %v1949_v38 = vld [vmem:[%s3769_s0 + $0x8] sm:$0xff] }
 0x5c1   : > { %1972 = vmatpush.msra.mxu2 %v1950_v37 }
 0x5c2   : > { %1790 = vmatpush.msra.mxu3 %v1764_v42  ;;  %v1948_v42 = vld [vmem:[%s3769_s0] sm:$0xff] }
 0x5c3   : > { %1973 = vmatpush.msra.mxu2 %v1949_v38 }
 0x5c4   : > { %1791 = vmatpush.msra.mxu3 %v1763_v44  ;;  %v3670_v44 = vld [vmem:[%s3770_s18] ss:$0 sm:$0xff] }
 0x5c5   : > { %1974 = vmatpush.msra.mxu2 %v1948_v42 }
 0x5c6   : > { %1792 = vmatpush.msra.mxu3 %v1762_v46 }
 0x5c8   : > { %1793 = vmatpush.msra.mxu3 %v1761_v48 }
 0x5ca   : > { %1794 = vmatpush.msra.mxu3 %v1760_v50 }
 0x62e   : > { %v1722_v40 = vpop.f32.mrf.mxu0 }
 0x62f   : > { %1751 = vrot.lane.b32.xlu2 %v1722_v40, %s3162_s1 }
 0x635   : > { %v1747_v41 = vpop.f32.mrf.mxu2 }
 0x636   : > { %v1697_v53 = vpop.f32.mrf.mxu3 }
 0x637   : > { %1755 = vrot.lane.b32.xlu2 %v1747_v41, %s3163_s7 }
 0x689   : > { %v1752_v52 = vpop.permute.xlu2 %1751 }
 0x68a   : > { %v1758_v54 = vsel %vm1199_vm2, %v1697_v53, %v1752_v52  ;;  %v2101_v52 = vld [vmem:[#allocation12 + $0x90] sm:$0xff]  ;;  %v2059_v53 = vld [vmem:[#allocation10 + $0x88] sm:$0xff] }
 0x691   : > { %v1756_v55 = vpop.permute.xlu2 %1755 }
 0x692   : > { %v1759_v56 = vsel %vm1307_vm4, %v1758_v54, %v1756_v55  ;;  %v2100_v54 = vld [vmem:[#allocation12 + $0x88] sm:$0xff] }
 0x693   : > { %2575 = vmatmul.msk.f32.vlgmr.msra.gmra.mxu3 %vm1325_vm5, %v1759_v56  ;;  %2576 = vmatmul.msk.f32.vlgmr.msra.gmra.mxu1 %vm1325_vm5, %v1759_v56 }
 0x710   : > { %v1832_v58 = vpop.f32.mrf.mxu1 }
 0x711   : > { %v1833_v59 = vadd.f32 %v2754_v57, %v1832_v58  ;;  %v2058_v57 = vld [vmem:[#allocation10 + $0x80] sm:$0xff] }
 0x712   : > { %v2099_v58 = vld [vmem:[#allocation12 + $0x80] sm:$0xff] }
 0x713   : > { %v2577_v60 = vmul.f32 -1.442695, %v1833_v59  ;;  %v2057_v59 = vld [vmem:[#allocation10 + $0x78] sm:$0xff] }
 0x715   : > { %2770 = vpow2.f32 %v2577_v60  ;;  %v2098_v60 = vld [vmem:[#allocation12 + $0x78] sm:$0xff] }
 0x716   : > { %v1796_v7 = vpop.f32.mrf.mxu3 }
 0x717   : > { %v1797_v11 = vadd.f32 %v2755_v3, %v1796_v7 }
 0x71b   : > { %v2771_v61 = vpop.eup %2770 }
 0x71c   : > { %v1838_v62 = vadd.f32 1.0, %v2771_v61  ;;  %v2056_v61 = vld [vmem:[#allocation10 + $0x70] sm:$0xff] }
 0x71e   : > { %2772 = vrcp.f32 %v1838_v62  ;;  %v1850_v2 = vand.u32 2147483648, %v1838_v62  ;;  %v1848_v6 = vand.u32 2147483647, %v1838_v62  ;;  %vm1844_vm15 = vweird.f32 %v1838_v62 }
 0x720   : > { %v1851_v9 = vor.u32 1.1754944e-38, %v1850_v2  ;;  %vm1849_vm1 = vcmp.eq.f32.partialorder %v1848_v6, 8.507059e+37  ;;  %v2095_v2 = vld [vmem:[#allocation12 + $0x60] sm:$0xff] }
 0x724   : > { %v2773_v63 = vpop.eup %2772 }
 0x725   : > { %v1840_v0 = vmul.f32 %v2773_v63, %v1838_v62  ;;  %vm1845_vm14 = vweird.f32 %v2773_v63  ;;  %v2097_v62 = vld [vmem:[#allocation12 + $0x70] sm:$0xff] }
 0x726   : > { %vm1846_vm0 = vmor %vm1844_vm15, %vm1845_vm14 }
 0x727   : > { %v1841_v1 = vsub.f32 1.0, %v1840_v0  ;;  %v2096_v0 = vld [vmem:[#allocation12 + $0x68] sm:$0xff] }
 0x729   : > { %v1842_v4 = vmul.f32 %v2773_v63, %v1841_v1  ;;  %v2054_v1 = vld [vmem:[#allocation10 + $0x60] sm:$0xff] }
 0x72b   : > { %v1843_v8 = vadd.f32 %v2773_v63, %v1842_v4 }
 0x72d   : > { %v1847_v13 = vsel %vm1846_vm0, %v2773_v63, %v1843_v8  ;;  %v2055_v63 = vld [vmem:[#allocation10 + $0x68] sm:$0xff] }
 0x72e   : > { %v1852_v16 = vsel %vm1849_vm1, %v1851_v9, %v1847_v13  ;;  %v2759_v9 = vld [vmem:[%s3766_s24 + $0x1] ss:$0 sm:$0xff] }
 0x72f   : > { %v1854_v14 = vmul.f32 %v1852_v16, %v1797_v11 }
 0x731   : > { %2578 = vmatmul.msk.f32.vlgmr.msrb.gmra.mxu0 %vm1199_vm2, %v1854_v14 }
 0x7ae   : > { %v1883_v23 = vpop.f32.mrf.mxu0 }
 0x7af   : > { %v1884_v10 = vadd.f32 %v3656_v5, %v1883_v23 }
 0x7b1   : > { %v1886_v27 = vadd.f32 %v1884_v10, %v3596_v12 }
 0x7b3   : > { %v1887_v28 = vmul.f32 0.70710677, %v1886_v27 }
 0x7b5   : > { %2580 = vmatmul.msk.f32.vlgmr.msrb.gmra.mxu2 %vm1199_vm2, %v1887_v28 }
 0x838   : > { %v1911_v29 = vpop.f32.mrf.mxu2 }
 0x839   : > { %v1914_v30 = vsel %vm1224_vm3, %v1911_v29, -inf }
 0x83a   : > { %1915 = vmax.xlane.f32.xlu0 %v1914_v30  ;;  %v2758_v30 = vld [vmem:[%s3767_s15 + $0x1] ss:$0 sm:$0xff] }
 0x8ad   : > { %v1916_v31 = vpop.xlane.xlu0 %1915 }
 0x8ae   : > { %v1917_v32 = vsub.f32 %v1911_v29, %v1916_v31 }
 0x8b0   : > { %v1918_v33 = vmul.f32 1.442695, %v1917_v32 }
 0x8b2   : > { %2774 = vpow2.f32 %v1918_v33 }
 0x8b8   : > { %v2775_v34 = vpop.eup %2774 }
 0x8b9   : > { %v1920_v35 = vsel %vm1224_vm3, %v2775_v34, 0.0 }
 0x8ba   : > { %1921 = vadd.xlane.f32.xlu1 %v1920_v35 }
 0x92d   : > { %v1922_v39 = vpop.xlane.xlu1 %1921 }
 0x92e   : > { %2776 = vrcp.f32 %v1922_v39 }
 0x934   : > { %v2777_v40 = vpop.eup %2776 }
 0x935   : > { %v1924_v41 = vmul.f32 %v2777_v40, %v2775_v34 }
 0x937   : > { %2581 = vmatmul.msk.f32.vlgmr.msra.gmra.mxu0 %vm1224_vm3, %v1924_v41 }
 0x9b4   : > { %v1945_v43 = vpop.f32.mrf.mxu0 }
 0x9b5   : > { %2582 = vmatmul.msk.f32.vlgmr.msra.gmra.mxu2 %vm1199_vm2, %v1945_v43 }
 0xa38   : > { %v1976_v45 = vpop.f32.mrf.mxu2 }
 0xa39   : > { %v1977_v46 = vadd.f32 %v3670_v44, %v1976_v45 }
 0xa3b   : > { %v1979_v47 = vadd.f32 %v1977_v46, %v1854_v14 }
 0xa3d   : > { %v1980_v48 = vmul.f32 0.70710677, %v1979_v47 }
 0xa3f   : > { %v1981_v49 = vadd.f32 %v1980_v48, %v3601_v17  ;;  %v2065_v17 = vld [vmem:[#allocation10 + $0xb8] sm:$0xff] }
 0xa40   : > { %2078 = vmatpush.msrb.mxu1 %v2065_v17 }
 0xa41   : > { %v3674_v50 = vmul.f32 0.70710677, %v1981_v49 }
 0xa43   : > { %1998 = vmatpush.msrb.mxu0 %v3674_v50  ;;  %2018 = vmatpush.msrb.mxu2 %v3674_v50 }
 0xa44   : > { %2038 = vmatpush.msrb.mxu3 %v3674_v50  ;;  %2584 = vmatmul.msk.f32.vlgmr.msrb.gmra.mxu2 %vm1224_vm3, %v3604_v18  ;;  %v2106_v18 = vld [vmem:[#allocation12 + $0xb8] sm:$0xff] }
 0xa45   : > { %2167 = vmatpush.msra.mxu2 %v3609_v19  ;;  %2585 = vmatmul.msk.f32.vlgmr.msrb.gmra.mxu3 %vm1224_vm3, %v3614_v20  ;;  %v2105_v19 = vld [vmem:[#allocation12 + $0xb0] sm:$0xff]  ;;  %v2063_v20 = vld [vmem:[#allocation10 + $0xa8] sm:$0xff] }
 0xa46   : > { %2592 = vmatpush.xpose.msk.msra.mxu3 %vm1199_vm2, %v3606_v15  ;;  %2583 = vmatmul.msk.f32.vlgmr.msrb.gmra.mxu0 %vm1224_vm3, %v3617_v21  ;;  %v2064_v15 = vld [vmem:[#allocation10 + $0xb0] sm:$0xff]  ;;  %v2104_v21 = vld [vmem:[#allocation12 + $0xa8] sm:$0xff] }
 0xa47   : > { %2168 = vmatpush.msra.mxu2 %v3623_v22  ;;  %2116 = vmatpush.msra.mxu0 %v2106_v18  ;;  %v2062_v22 = vld [vmem:[#allocation10 + $0xa0] sm:$0xff] }
 0xa48   : > { %2079 = vmatpush.msrb.mxu1 %v2064_v15 }
 0xa49   : > { %2169 = vmatpush.msra.mxu2 %v3633_v24  ;;  %2117 = vmatpush.msra.mxu0 %v2105_v19  ;;  %v2061_v24 = vld [vmem:[#allocation10 + $0x98] sm:$0xff] }
 0xa4a   : > { %2249 = vmatpush.msrb.mxu3 %v1951_v36  ;;  %2080 = vmatpush.msrb.mxu1 %v2063_v20 }
 0xa4b   : > { %2170 = vmatpush.msra.mxu2 %v3639_v25  ;;  %2118 = vmatpush.msra.mxu0 %v2104_v21  ;;  %v2102_v25 = vld [vmem:[#allocation12 + $0x98] sm:$0xff] }
 0xa4c   : > { %2250 = vmatpush.msrb.mxu3 %v1950_v37  ;;  %2081 = vmatpush.msrb.mxu1 %v2062_v22 }
 0xa4d   : > { %2229 = vmatpush.msrb.mxu2 %v3642_v26  ;;  %2119 = vmatpush.msra.mxu0 %v2103_v51  ;;  %v2060_v26 = vld [vmem:[#allocation10 + $0x90] sm:$0xff] }
 0xa4e   : > { %2251 = vmatpush.msrb.mxu3 %v1949_v38  ;;  %2082 = vmatpush.msrb.mxu1 %v2061_v24  ;;  %v2295_v24 = vld [vmem:[#allocation15 + $0x18] sm:$0xff] }
 0xa4f   : > { %2120 = vmatpush.msra.mxu0 %v2102_v25  ;;  %v2294_v25 = vld [vmem:[#allocation15 + $0x10] sm:$0xff] }
 0xa50   : > { %2252 = vmatpush.msrb.mxu3 %v1948_v42  ;;  %2083 = vmatpush.msrb.mxu1 %v2060_v26 }
 0xa51   : > { %2121 = vmatpush.msra.mxu0 %v2101_v52 }
 0xa52   : > { %2084 = vmatpush.msrb.mxu1 %v2059_v53 }
 0xa53   : > { %2122 = vmatpush.msra.mxu0 %v2100_v54 }
 0xa54   : > { %2085 = vmatpush.msrb.mxu1 %v2058_v57  ;;  %v2293_v57 = vld [vmem:[#allocation15 + $0x8] sm:$0xff] }
 0xa55   : > { %2123 = vmatpush.msra.mxu0 %v2099_v58  ;;  %v2292_v58 = vld [vmem:[#allocation15] sm:$0xff] }
 0xa56   : > { %2086 = vmatpush.msrb.mxu1 %v2057_v59  ;;  %v2760_v59 = vld [vmem:[#allocation13] ss:$0 sm:$0xff] }
 0xa57   : > { %2124 = vmatpush.msra.mxu0 %v2098_v60 }
 0xa58   : > { %2087 = vmatpush.msrb.mxu1 %v2056_v61 }
 0xa59   : > { %2125 = vmatpush.msra.mxu0 %v2097_v62  ;;  %v2761_v62 = vld [vmem:[#allocation16] ss:$0 sm:$0xff] }
 0xa5a   : > { %2088 = vmatpush.msrb.mxu1 %v2055_v63 }
 0xa5b   : > { %2126 = vmatpush.msra.mxu0 %v2096_v0 }
 0xa5c   : > { %2089 = vmatpush.msrb.mxu1 %v2054_v1 }
 0xa5d   : > { %2127 = vmatpush.msra.mxu0 %v2095_v2 }
 0xac3   : > { %v2000_v4 = vpop.f32.mrf.mxu0 }
 0xac7   : > { %v2020_v55 = vpop.f32.mrf.mxu2 }
 0xac8   : > { %2044 = vrot.lane.b32.xlu2 %v2020_v55, %s3162_s1  ;;  %v2040_v56 = vpop.f32.mrf.mxu3  ;;  %s3771_s1 = sld [smem:[#allocation40_spill]] }
 0xace   : > { %v2264_v20 = vld [vmem:[%s3771_s1 + $0x18] sm:$0xff]  ;;  %v2263_v21 = vld [vmem:[%s3771_s1 + $0x10] sm:$0xff]  ;;  %v2262_v22 = vld [vmem:[%s3771_s1 + $0x8] sm:$0xff] }
 0xacf   : > { %v2261_v51 = vld [vmem:[%s3771_s1] sm:$0xff] }
 0xad0   : > { %2048 = vrot.lane.b32.xlu2 %v2040_v56, %s3163_s7  ;;  %s1154_s7 = scalar_lea.vmem %s3332_s20, %s3515_s2 }
 0xb22   : > { %v2045_v3 = vpop.permute.xlu2 %2044 }
 0xb23   : > { %v2051_v6 = vsel %vm1199_vm2, %v2000_v4, %v2045_v3 }
 0xb2a   : > { %v2049_v7 = vpop.permute.xlu2 %2048 }
 0xb2b   : > { %v2052_v8 = vsel %vm1307_vm4, %v2051_v6, %v2049_v7 }
 0xb2c   : > { %2587 = vmatmul.msk.f32.vlgmr.msrb.gmra.mxu1 %vm1325_vm5, %v2052_v8  ;;  %2589 = vmatmul.msk.f32.vlgmr.msra.gmra.mxu0 %vm1325_vm5, %v2052_v8 }
 0xba9   : > { %v2129_v11 = vpop.f32.mrf.mxu0  ;;  %v2091_v33 = vpop.f32.mrf.mxu1 }
 0xbaa   : > { %v2130_v13 = vadd.f32 %v2759_v9, %v2129_v11  ;;  %v2092_v36 = vadd.f32 %v2758_v30, %v2091_v33 }
 0xbac   : > { %v2590_v16 = vmul.f32 -1.442695, %v2130_v13 }
 0xbae   : > { %2778 = vpow2.f32 %v2590_v16 }
 0xbb4   : > { %v2779_v14 = vpop.eup %2778 }
 0xbb5   : > { %v2135_v23 = vadd.f32 1.0, %v2779_v14 }
 0xbb7   : > { %2780 = vrcp.f32 %v2135_v23  ;;  %v2147_v29 = vand.u32 2147483648, %v2135_v23  ;;  %v2145_v32 = vand.u32 2147483647, %v2135_v23  ;;  %vm2141_vm4 = vweird.f32 %v2135_v23 }
 0xbb9   : > { %v2148_v35 = vor.u32 1.1754944e-38, %v2147_v29  ;;  %vm2146_vm7 = vcmp.eq.f32.partialorder %v2145_v32, 8.507059e+37 }
 0xbbd   : > { %v2781_v10 = vpop.eup %2780 }
 0xbbe   : > { %v2137_v27 = vmul.f32 %v2781_v10, %v2135_v23  ;;  %vm2142_vm6 = vweird.f32 %v2781_v10 }
 0xbbf   : > { %vm2143_vm5 = vmor %vm2141_vm4, %vm2142_vm6 }
 0xbc0   : > { %v2138_v28 = vsub.f32 1.0, %v2137_v27 }
 0xbc2   : > { %v2139_v31 = vmul.f32 %v2781_v10, %v2138_v28 }
 0xbc4   : > { %v2140_v34 = vadd.f32 %v2781_v10, %v2139_v31 }
 0xbc6   : > { %v2144_v37 = vsel %vm2143_vm5, %v2781_v10, %v2140_v34 }
 0xbc7   : > { %v2149_v38 = vsel %vm2146_vm7, %v2148_v35, %v2144_v37 }
 0xbc8   : > { %v2151_v39 = vmul.f32 %v2149_v38, %v2092_v36 }
 0xbca   : > { %2591 = vmatmul.msk.f32.vlgmr.msra.gmra.mxu2 %vm1199_vm2, %v2151_v39 }
 0xbcb   : > { %2284 = vmatpush.msra.mxu2 %v2264_v20 }
 0xbcd   : > { %2285 = vmatpush.msra.mxu2 %v2263_v21 }
 0xbcf   : > { %2286 = vmatpush.msra.mxu2 %v2262_v22 }
 0xbd1   : > { %2287 = vmatpush.msra.mxu2 %v2261_v51 }
 0xc4d   : > { %v2172_v40 = vpop.f32.mrf.mxu2 }
 0xc4e   : > { %v2173_v41 = vadd.f32 %v3656_v5, %v2172_v40 }
 0xc50   : > { %v2175_v42 = vadd.f32 %v2173_v41, %v3596_v12 }
 0xc52   : > { %v2176_v43 = vmul.f32 0.70710677, %v2175_v42 }
 0xc54   : > { %2593 = vmatmul.msk.f32.vlgmr.msra.gmra.mxu3 %vm1199_vm2, %v2176_v43 }
 0xc55   : > { %2315 = vmatpush.msra.mxu3 %v2295_v24 }
 0xc57   : > { %2316 = vmatpush.msra.mxu3 %v2294_v25 }
 0xc59   : > { %2317 = vmatpush.msra.mxu3 %v2293_v57 }
 0xc5b   : > { %2318 = vmatpush.msra.mxu3 %v2292_v58 }
 0xcd7   : > { %v2197_v45 = vpop.f32.mrf.mxu3 }
 0xcd8   : > { %v2200_v46 = vsel %vm1224_vm3, %v2197_v45, -inf }
 0xcd9   : > { %2201 = vmax.xlane.f32.xlu2 %v2200_v46 }
 0xd4c   : > { %v2202_v47 = vpop.xlane.xlu2 %2201 }
 0xd4d   : > { %v2203_v48 = vsub.f32 %v2197_v45, %v2202_v47 }
 0xd4f   : > { %v2204_v49 = vmul.f32 1.442695, %v2203_v48 }
 0xd51   : > { %2782 = vpow2.f32 %v2204_v49 }
 0xd57   : > { %v2783_v17 = vpop.eup %2782 }
 0xd58   : > { %v2206_v5 = vsel %vm1224_vm3, %v2783_v17, 0.0 }
 0xd59   : > { %2207 = vadd.xlane.f32.xlu0 %v2206_v5 }
 0xdcc   : > { %v2208_v12 = vpop.xlane.xlu0 %2207 }
 0xdcd   : > { %2784 = vrcp.f32 %v2208_v12 }
 0xdd3   : > { %v2785_v18 = vpop.eup %2784 }
 0xdd4   : > { %v2210_v15 = vmul.f32 %v2785_v18, %v2783_v17 }
 0xdd6   : > { %2594 = vmatmul.msk.f32.vlgmr.msrb.gmra.mxu2 %vm1224_vm3, %v2210_v15 }
 0xe59   : > { %v2231_v19 = vpop.f32.mrf.mxu2 }
 0xe5a   : > { %2595 = vmatmul.msk.f32.vlgmr.msrb.gmra.mxu3 %vm1199_vm2, %v2231_v19 }
 0xedd   : > { %v2254_v26 = vpop.f32.mrf.mxu3 }
 0xede   : > { %v2255_v52 = vadd.f32 %v3670_v44, %v2254_v26 }
 0xee0   : > { %v2257_v53 = vadd.f32 %v2255_v52, %v2151_v39 }
 0xee2   : > { %v2258_v54 = vmul.f32 0.70710677, %v2257_v53 }
 0xee4   : > { %v2259_v55 = vadd.f32 %v2258_v54, %v3674_v50 }
 0xee6   : > { %v2260_v56 = vmul.f32 0.70710677, %v2259_v55 }
 0xee8   : > { %2596 = vmatmul.msk.f32.vlgmr.msra.gmra.mxu2 %vm1199_vm2, %v2260_v56 }
 0xf6b   : > { %v2289_v60 = vpop.f32.mrf.mxu2 }
 0xf6c   : > { %v2290_v61 = vadd.f32 %v2760_v59, %v2289_v60 }
 0xf6e   : > { %2597 = vmatmul.msk.f32.vlgmr.msra.gmra.mxu3 %vm1199_vm2, %v2290_v61 }
 0xff1   : > { %v2320_v63 = vpop.f32.mrf.mxu3 }
 0xff2   : > { %v2321_v44 = vadd.f32 %v2761_v62, %v2320_v63 }
 0xff4   : > { %2323 = vst [vmem:[%s1154_s7] sm:$0xff] %v2321_v44 }
 0xff5 PF: > { %s3772_s23 = sld [smem:[#allocation41_spill]] }
 0xffb   : > { %s81_s28 = sadd.s32 1, %s3772_s23  }
 0xffc   : > { %p78_p2 = scmp.ge.s32.totalorder %s81_s28, 4  }
 0xffe   :  { %80 = sbr.rel (!%p78_p2) target bundleno = 59 (0x3b), region = 266 }
0x1003   :  { %2343 = vsyncpa [#allocation3], 1 }
0x1004   :  { %2345 = vsyncpa [#allocation3 + $0x1], 1 }
0x1005   :  { %2346 = vsyncpa [#allocation5], 1 }
0x1006   :  { %2347 = vsyncpa [#allocation8], 1 }
0x1007   :  { %2348 = vsyncpa [#allocation11], 1 }
0x1008   :  { %2349 = vsyncpa [#allocation14], 1 }
0x1009   :  { %2350 = vsyncpa [#allocation17], 1 }

</bundles_post_ra>
